<compile_context>
chip_gen: v5e
topology: v5e:2x2
jax: 0.10.0
libtpu: 0.0.40
codegen_flags: <defaults>
</compile_context>

<pallas_src>
import functools

import jax
import jax.numpy as jnp
from jax import lax
from jax.experimental import pallas as pl
from jax.experimental.pallas import tpu as pltpu

IN_FEATURE = 3
N_OUT = 3                        # Q_k
N_HIDDEN = 2 * IN_FEATURE + 1    # 7
N_OUT2 = 2 * N_OUT               # 6 outputs per branch
HID2 = 2 * N_HIDDEN              # 14 fused hidden rows (P | R)
OUT_DIM = 2 * N_OUT2             # 12 = cat([P(x), R(x)], dim=1)

LANE = 128                       # vreg lane width
SUBLANE = 8                      # f32 sublanes per vreg


def mmann_kernel(w1_ref, b1_ref, w2_ref, b2_ref, x_ref, out_ref, *,
                 compute_dtype):
    """VPU-only fused MLP over a lane-dense batch tile.

    x_ref  : (IN_FEATURE, TR, 128) f32 VMEM
    out_ref: (OUT_DIM,    TR, 128) out_dtype VMEM
    w1_ref : (HID2*IN_FEATURE,)  f32 SMEM  -- fused [W1p; W1r], row-major (out,in)
    b1_ref : (HID2,)             f32 SMEM
    w2_ref : (OUT_DIM*N_HIDDEN,) f32 SMEM  -- fused [W2p; W2r], row-major (out,in)
    b2_ref : (OUT_DIM,)          f32 SMEM
    """
    tr = x_ref.shape[1]
    n_chunks = tr // SUBLANE
    cd = compute_dtype

    # Hoist all scalar weight reads (126 sld) out of the batch loop.
    w1 = [[w1_ref[j * IN_FEATURE + k].astype(cd) for k in range(IN_FEATURE)]
          for j in range(HID2)]
    w2 = [[w2_ref[j * N_HIDDEN + k].astype(cd) for k in range(N_HIDDEN)]
          for j in range(OUT_DIM)]
    # Hoist the 26 bias splats out of the chunk loop: one vbcast per tile,
    # not one per (8,128) chunk (~10% of the VALU budget otherwise).
    b1s = [jnp.full((SUBLANE, LANE), b1_ref[j], cd) for j in range(HID2)]
    b2s = [jnp.full((SUBLANE, LANE), b2_ref[j], cd) for j in range(OUT_DIM)]

    def body(c, carry):
        s = pl.multiple_of(c * SUBLANE, SUBLANE)
        xs = [x_ref[k, pl.ds(s, SUBLANE), :].astype(cd)
              for k in range(IN_FEATURE)]

        # Fused first layer (rows 0..6 = P, rows 7..13 = R):
        # h = relu(W1 @ x + b1) as scalar-broadcast mul/adds on (8,128) slabs.
        h = []
        for j in range(HID2):
            acc = b1s[j] + w1[j][0] * xs[0]
            for k in range(1, IN_FEATURE):
                acc = acc + w1[j][k] * xs[k]
            h.append(jnp.maximum(acc, 0))

        # Fused second layer: output rows 0..5 read the P hidden block, rows
        # 6..11 the R hidden block.  Each row is stored as a dense, unmasked
        # (8,128) slab -> equivalent to torch.cat([P(x), R(x)], dim=1).
        for j in range(OUT_DIM):
            base = 0 if j < N_OUT2 else N_HIDDEN
            acc = b2s[j] + w2[j][0] * h[base]
            for k in range(1, N_HIDDEN):
                acc = acc + w2[j][k] * h[base + k]
            out_ref[j, pl.ds(s, SUBLANE), :] = acc.astype(out_ref.dtype)

        return carry

    # Capped unroll: keeps LLO scheduling visibility without duplicating the
    # ~280-op body 64x at tr=512 (and keeps vreg pressure with the hoisted
    # bias splats well under 64).
    lax.fori_loop(0, n_chunks, body, 0, unroll=max(1, min(4, n_chunks)))


def _round_up(n, m):
    return (n + m - 1) // m * m


@functools.partial(jax.jit, static_argnames=(
    "tile_rows", "transposed_output", "compute_dtype", "out_dtype"))
def mmann_forward(x, params, tile_rows=512, transposed_output=False,
                  compute_dtype=jnp.float32, out_dtype=jnp.float32):
    """MMANN forward, ann_out=True path:  cat([P(x), R(x)], dim=1).

    x: (B, IN_FEATURE) f32.
    params: PyTorch-convention Linear weights: w* of shape (out, in), b* (out,).
    transposed_output=True returns the lane-transposed (OUT_DIM, B) result and
    skips the wrapper-side output transpose (preferred when the consumer can
    take that layout).  compute_dtype=jnp.bfloat16 is an opt-in for v6e/v7x;
    out_dtype=jnp.bfloat16 halves the dominant output write traffic on v5e.
    """
    B = x.shape[0]
    assert x.shape[1] == IN_FEATURE
    assert tile_rows % SUBLANE == 0

    # Fuse the P and R branches once on the host side.
    w1 = jnp.concatenate([params["w1p"], params["w1r"]], axis=0)   # (14, 3)
    b1 = jnp.concatenate([params["b1p"], params["b1r"]], axis=0)   # (14,)
    w2 = jnp.concatenate([params["w2p"], params["w2r"]], axis=0)   # (12, 7)
    b2 = jnp.concatenate([params["b2p"], params["b2r"]], axis=0)   # (12,)
    w1f = w1.astype(jnp.float32).reshape(-1)                       # (42,)
    w2f = w2.astype(jnp.float32).reshape(-1)                       # (84,)

    # Transposed, lane-dense layout: batch mapped onto (sublane-rows, 128 lanes).
    rows = _round_up(_round_up(B, LANE) // LANE, SUBLANE)
    tr = min(tile_rows, rows)
    if rows > SUBLANE:
        # Guarantee >= 2 grid steps so ("parallel",) can shard across both
        # v7x TensorCores even for mid-size batches.
        tr = min(tr, _round_up(-(-rows // 2), SUBLANE))
    rows = _round_up(rows, tr)
    bp = rows * LANE

    xt = jnp.pad(x.astype(jnp.float32).T, ((0, 0), (0, bp - B)))
    xt = xt.reshape(IN_FEATURE, rows, LANE)

    # Double-buffered per-step VMEM footprint; only raise the scoped limit if
    # a caller pushes tile_rows past what the 32 MiB default covers.
    out_itemsize = jnp.dtype(out_dtype).itemsize
    vmem_bytes = 2 * tr * LANE * (IN_FEATURE * 4 + OUT_DIM * out_itemsize)
    cp_kwargs = dict(dimension_semantics=("parallel",))
    if vmem_bytes > 24 * 1024 * 1024:
        cp_kwargs["vmem_limit_bytes"] = int(vmem_bytes * 1.5)

    kern = functools.partial(mmann_kernel, compute_dtype=compute_dtype)
    out3 = pl.pallas_call(
        kern,
        out_shape=jax.ShapeDtypeStruct((OUT_DIM, rows, LANE), out_dtype),
        grid=(rows // tr,),
        in_specs=[
            pl.BlockSpec(memory_space=pltpu.MemorySpace.SMEM),   # w1 (flat)
            pl.BlockSpec(memory_space=pltpu.MemorySpace.SMEM),   # b1
            pl.BlockSpec(memory_space=pltpu.MemorySpace.SMEM),   # w2 (flat)
            pl.BlockSpec(memory_space=pltpu.MemorySpace.SMEM),   # b2
            pl.BlockSpec((IN_FEATURE, tr, LANE), lambda i: (0, i, 0)),
        ],
        out_specs=pl.BlockSpec((OUT_DIM, tr, LANE), lambda i: (0, i, 0)),
        compiler_params=pltpu.CompilerParams(**cp_kwargs),
    )(w1f, b1.astype(jnp.float32), w2f, b2.astype(jnp.float32), xt)

    out_t = out3.reshape(OUT_DIM, bp)[:, :B]       # (OUT_DIM, B)
    if transposed_output:
        return out_t
    # PyTorch layout (B, OUT_DIM).  Prefer transposed_output=True (or fuse this
    # transpose into the consumer) when end-to-end HBM traffic matters.
    return out_t.T


def init_params(key):
    """Deterministic init mimicking PyTorch nn.Linear defaults
    (uniform in +/- 1/sqrt(fan_in)); weights stored (out, in) like PyTorch."""
    ks = jax.random.split(key, 8)

    def lin(kw, kb, fan_in, fan_out):
        bound = 1.0 / float(fan_in) ** 0.5
        w = jax.random.uniform(kw, (fan_out, fan_in), jnp.float32, -bound, bound)
        b = jax.random.uniform(kb, (fan_out,), jnp.float32, -bound, bound)
        return w, b

    w1p, b1p = lin(ks[0], ks[1], IN_FEATURE, N_HIDDEN)
    w2p, b2p = lin(ks[2], ks[3], N_HIDDEN, N_OUT2)
    w1r, b1r = lin(ks[4], ks[5], IN_FEATURE, N_HIDDEN)
    w2r, b2r = lin(ks[6], ks[7], N_HIDDEN, N_OUT2)
    return dict(w1p=w1p, b1p=b1p, w2p=w2p, b2p=b2p,
                w1r=w1r, b1r=b1r, w2r=w2r, b2r=b2r)


def mmann_reference(x, p):
    """Pure-JAX reference of the same forward for the correctness check."""
    hp = jnp.maximum(x @ p["w1p"].T + p["b1p"], 0.0)
    pp = hp @ p["w2p"].T + p["b2p"]
    hr = jnp.maximum(x @ p["w1r"].T + p["b1r"], 0.0)
    rr = hr @ p["w2r"].T + p["b2r"]
    return jnp.concatenate([pp, rr], axis=1)


if __name__ == "__main__":
    key = jax.random.PRNGKey(0)
    k_x, k_p = jax.random.split(key)

    # Non-multiple of 1024 -> exercises the batch padding; the wrapper forces
    # a 2-step "parallel" grid so both v7x TensorCores are exercised.
    B = 1500
    x = jax.random.normal(k_x, (B, IN_FEATURE), jnp.float32)
    params = init_params(k_p)

    ref = mmann_reference(x, params)

    # Default path: PyTorch-layout (B, OUT_DIM) output.
    out = jax.block_until_ready(mmann_forward(x, params))
    assert out.shape == (B, OUT_DIM)
    assert jnp.allclose(out, ref, atol=1e-5, rtol=1e-5), "mismatch vs reference"

    # Transposed-output path: skips the wrapper-side output transpose.
    out_t = jax.block_until_ready(
        mmann_forward(x, params, transposed_output=True))
    assert out_t.shape == (OUT_DIM, B)
    assert jnp.allclose(out_t.T, ref, atol=1e-5, rtol=1e-5), "mismatch (transposed)"

    print("KERNEL_OK")
</pallas_src>

<mosaic_0001>
module attributes {stable_mosaic.version = 11 : i64} {
  func.func @mmann_kernel(%arg0: i32, %arg1: memref<42xf32, #tpu.memory_space<smem>>, %arg2: memref<14xf32, #tpu.memory_space<smem>>, %arg3: memref<84xf32, #tpu.memory_space<smem>>, %arg4: memref<12xf32, #tpu.memory_space<smem>>, %arg5: memref<3x8x128xf32, #tpu.memory_space<vmem>>, %arg6: memref<12x8x128xf32, #tpu.memory_space<vmem>>) attributes {dimension_semantics = [#tpu.dimension_semantics<parallel>], iteration_bounds = array<i64: 2>, scalar_prefetch = 0 : i64, scratch_operands = 0 : i64, tpu.core_type = #tpu.core_type<tc>, window_params = [{transform_indices = @transform_0, window_bounds = array<i64: 42>}, {transform_indices = @transform_1, window_bounds = array<i64: 14>}, {transform_indices = @transform_2, window_bounds = array<i64: 84>}, {transform_indices = @transform_3, window_bounds = array<i64: 12>}, {transform_indices = @transform_4, window_bounds = array<i64: 3, 8, 128>}, {transform_indices = @transform_5, window_bounds = array<i64: 12, 8, 128>}]} {
    %c0 = arith.constant 0 : index
    %0 = memref.load %arg1[%c0] : memref<42xf32, #tpu.memory_space<smem>>
    %c1 = arith.constant 1 : index
    %1 = memref.load %arg1[%c1] : memref<42xf32, #tpu.memory_space<smem>>
    %c2 = arith.constant 2 : index
    %2 = memref.load %arg1[%c2] : memref<42xf32, #tpu.memory_space<smem>>
    %c3 = arith.constant 3 : index
    %3 = memref.load %arg1[%c3] : memref<42xf32, #tpu.memory_space<smem>>
    %c4 = arith.constant 4 : index
    %4 = memref.load %arg1[%c4] : memref<42xf32, #tpu.memory_space<smem>>
    %c5 = arith.constant 5 : index
    %5 = memref.load %arg1[%c5] : memref<42xf32, #tpu.memory_space<smem>>
    %c6 = arith.constant 6 : index
    %6 = memref.load %arg1[%c6] : memref<42xf32, #tpu.memory_space<smem>>
    %c7 = arith.constant 7 : index
    %7 = memref.load %arg1[%c7] : memref<42xf32, #tpu.memory_space<smem>>
    %c8 = arith.constant 8 : index
    %8 = memref.load %arg1[%c8] : memref<42xf32, #tpu.memory_space<smem>>
    %c9 = arith.constant 9 : index
    %9 = memref.load %arg1[%c9] : memref<42xf32, #tpu.memory_space<smem>>
    %c10 = arith.constant 10 : index
    %10 = memref.load %arg1[%c10] : memref<42xf32, #tpu.memory_space<smem>>
    %c11 = arith.constant 11 : index
    %11 = memref.load %arg1[%c11] : memref<42xf32, #tpu.memory_space<smem>>
    %c12 = arith.constant 12 : index
    %12 = memref.load %arg1[%c12] : memref<42xf32, #tpu.memory_space<smem>>
    %c13 = arith.constant 13 : index
    %13 = memref.load %arg1[%c13] : memref<42xf32, #tpu.memory_space<smem>>
    %c14 = arith.constant 14 : index
    %14 = memref.load %arg1[%c14] : memref<42xf32, #tpu.memory_space<smem>>
    %c15 = arith.constant 15 : index
    %15 = memref.load %arg1[%c15] : memref<42xf32, #tpu.memory_space<smem>>
    %c16 = arith.constant 16 : index
    %16 = memref.load %arg1[%c16] : memref<42xf32, #tpu.memory_space<smem>>
    %c17 = arith.constant 17 : index
    %17 = memref.load %arg1[%c17] : memref<42xf32, #tpu.memory_space<smem>>
    %c18 = arith.constant 18 : index
    %18 = memref.load %arg1[%c18] : memref<42xf32, #tpu.memory_space<smem>>
    %c19 = arith.constant 19 : index
    %19 = memref.load %arg1[%c19] : memref<42xf32, #tpu.memory_space<smem>>
    %c20 = arith.constant 20 : index
    %20 = memref.load %arg1[%c20] : memref<42xf32, #tpu.memory_space<smem>>
    %c21 = arith.constant 21 : index
    %21 = memref.load %arg1[%c21] : memref<42xf32, #tpu.memory_space<smem>>
    %c22 = arith.constant 22 : index
    %22 = memref.load %arg1[%c22] : memref<42xf32, #tpu.memory_space<smem>>
    %c23 = arith.constant 23 : index
    %23 = memref.load %arg1[%c23] : memref<42xf32, #tpu.memory_space<smem>>
    %c24 = arith.constant 24 : index
    %24 = memref.load %arg1[%c24] : memref<42xf32, #tpu.memory_space<smem>>
    %c25 = arith.constant 25 : index
    %25 = memref.load %arg1[%c25] : memref<42xf32, #tpu.memory_space<smem>>
    %c26 = arith.constant 26 : index
    %26 = memref.load %arg1[%c26] : memref<42xf32, #tpu.memory_space<smem>>
    %c27 = arith.constant 27 : index
    %27 = memref.load %arg1[%c27] : memref<42xf32, #tpu.memory_space<smem>>
    %c28 = arith.constant 28 : index
    %28 = memref.load %arg1[%c28] : memref<42xf32, #tpu.memory_space<smem>>
    %c29 = arith.constant 29 : index
    %29 = memref.load %arg1[%c29] : memref<42xf32, #tpu.memory_space<smem>>
    %c30 = arith.constant 30 : index
    %30 = memref.load %arg1[%c30] : memref<42xf32, #tpu.memory_space<smem>>
    %c31 = arith.constant 31 : index
    %31 = memref.load %arg1[%c31] : memref<42xf32, #tpu.memory_space<smem>>
    %c32 = arith.constant 32 : index
    %32 = memref.load %arg1[%c32] : memref<42xf32, #tpu.memory_space<smem>>
    %c33 = arith.constant 33 : index
    %33 = memref.load %arg1[%c33] : memref<42xf32, #tpu.memory_space<smem>>
    %c34 = arith.constant 34 : index
    %34 = memref.load %arg1[%c34] : memref<42xf32, #tpu.memory_space<smem>>
    %c35 = arith.constant 35 : index
    %35 = memref.load %arg1[%c35] : memref<42xf32, #tpu.memory_space<smem>>
    %c36 = arith.constant 36 : index
    %36 = memref.load %arg1[%c36] : memref<42xf32, #tpu.memory_space<smem>>
    %c37 = arith.constant 37 : index
    %37 = memref.load %arg1[%c37] : memref<42xf32, #tpu.memory_space<smem>>
    %c38 = arith.constant 38 : index
    %38 = memref.load %arg1[%c38] : memref<42xf32, #tpu.memory_space<smem>>
    %c39 = arith.constant 39 : index
    %39 = memref.load %arg1[%c39] : memref<42xf32, #tpu.memory_space<smem>>
    %c40 = arith.constant 40 : index
    %40 = memref.load %arg1[%c40] : memref<42xf32, #tpu.memory_space<smem>>
    %c41 = arith.constant 41 : index
    %41 = memref.load %arg1[%c41] : memref<42xf32, #tpu.memory_space<smem>>
    %c0_0 = arith.constant 0 : index
    %42 = memref.load %arg3[%c0_0] : memref<84xf32, #tpu.memory_space<smem>>
    %c1_1 = arith.constant 1 : index
    %43 = memref.load %arg3[%c1_1] : memref<84xf32, #tpu.memory_space<smem>>
    %c2_2 = arith.constant 2 : index
    %44 = memref.load %arg3[%c2_2] : memref<84xf32, #tpu.memory_space<smem>>
    %c3_3 = arith.constant 3 : index
    %45 = memref.load %arg3[%c3_3] : memref<84xf32, #tpu.memory_space<smem>>
    %c4_4 = arith.constant 4 : index
    %46 = memref.load %arg3[%c4_4] : memref<84xf32, #tpu.memory_space<smem>>
    %c5_5 = arith.constant 5 : index
    %47 = memref.load %arg3[%c5_5] : memref<84xf32, #tpu.memory_space<smem>>
    %c6_6 = arith.constant 6 : index
    %48 = memref.load %arg3[%c6_6] : memref<84xf32, #tpu.memory_space<smem>>
    %c7_7 = arith.constant 7 : index
    %49 = memref.load %arg3[%c7_7] : memref<84xf32, #tpu.memory_space<smem>>
    %c8_8 = arith.constant 8 : index
    %50 = memref.load %arg3[%c8_8] : memref<84xf32, #tpu.memory_space<smem>>
    %c9_9 = arith.constant 9 : index
    %51 = memref.load %arg3[%c9_9] : memref<84xf32, #tpu.memory_space<smem>>
    %c10_10 = arith.constant 10 : index
    %52 = memref.load %arg3[%c10_10] : memref<84xf32, #tpu.memory_space<smem>>
    %c11_11 = arith.constant 11 : index
    %53 = memref.load %arg3[%c11_11] : memref<84xf32, #tpu.memory_space<smem>>
    %c12_12 = arith.constant 12 : index
    %54 = memref.load %arg3[%c12_12] : memref<84xf32, #tpu.memory_space<smem>>
    %c13_13 = arith.constant 13 : index
    %55 = memref.load %arg3[%c13_13] : memref<84xf32, #tpu.memory_space<smem>>
    %c14_14 = arith.constant 14 : index
    %56 = memref.load %arg3[%c14_14] : memref<84xf32, #tpu.memory_space<smem>>
    %c15_15 = arith.constant 15 : index
    %57 = memref.load %arg3[%c15_15] : memref<84xf32, #tpu.memory_space<smem>>
    %c16_16 = arith.constant 16 : index
    %58 = memref.load %arg3[%c16_16] : memref<84xf32, #tpu.memory_space<smem>>
    %c17_17 = arith.constant 17 : index
    %59 = memref.load %arg3[%c17_17] : memref<84xf32, #tpu.memory_space<smem>>
    %c18_18 = arith.constant 18 : index
    %60 = memref.load %arg3[%c18_18] : memref<84xf32, #tpu.memory_space<smem>>
    %c19_19 = arith.constant 19 : index
    %61 = memref.load %arg3[%c19_19] : memref<84xf32, #tpu.memory_space<smem>>
    %c20_20 = arith.constant 20 : index
    %62 = memref.load %arg3[%c20_20] : memref<84xf32, #tpu.memory_space<smem>>
    %c21_21 = arith.constant 21 : index
    %63 = memref.load %arg3[%c21_21] : memref<84xf32, #tpu.memory_space<smem>>
    %c22_22 = arith.constant 22 : index
    %64 = memref.load %arg3[%c22_22] : memref<84xf32, #tpu.memory_space<smem>>
    %c23_23 = arith.constant 23 : index
    %65 = memref.load %arg3[%c23_23] : memref<84xf32, #tpu.memory_space<smem>>
    %c24_24 = arith.constant 24 : index
    %66 = memref.load %arg3[%c24_24] : memref<84xf32, #tpu.memory_space<smem>>
    %c25_25 = arith.constant 25 : index
    %67 = memref.load %arg3[%c25_25] : memref<84xf32, #tpu.memory_space<smem>>
    %c26_26 = arith.constant 26 : index
    %68 = memref.load %arg3[%c26_26] : memref<84xf32, #tpu.memory_space<smem>>
    %c27_27 = arith.constant 27 : index
    %69 = memref.load %arg3[%c27_27] : memref<84xf32, #tpu.memory_space<smem>>
    %c28_28 = arith.constant 28 : index
    %70 = memref.load %arg3[%c28_28] : memref<84xf32, #tpu.memory_space<smem>>
    %c29_29 = arith.constant 29 : index
    %71 = memref.load %arg3[%c29_29] : memref<84xf32, #tpu.memory_space<smem>>
    %c30_30 = arith.constant 30 : index
    %72 = memref.load %arg3[%c30_30] : memref<84xf32, #tpu.memory_space<smem>>
    %c31_31 = arith.constant 31 : index
    %73 = memref.load %arg3[%c31_31] : memref<84xf32, #tpu.memory_space<smem>>
    %c32_32 = arith.constant 32 : index
    %74 = memref.load %arg3[%c32_32] : memref<84xf32, #tpu.memory_space<smem>>
    %c33_33 = arith.constant 33 : index
    %75 = memref.load %arg3[%c33_33] : memref<84xf32, #tpu.memory_space<smem>>
    %c34_34 = arith.constant 34 : index
    %76 = memref.load %arg3[%c34_34] : memref<84xf32, #tpu.memory_space<smem>>
    %c35_35 = arith.constant 35 : index
    %77 = memref.load %arg3[%c35_35] : memref<84xf32, #tpu.memory_space<smem>>
    %c36_36 = arith.constant 36 : index
    %78 = memref.load %arg3[%c36_36] : memref<84xf32, #tpu.memory_space<smem>>
    %c37_37 = arith.constant 37 : index
    %79 = memref.load %arg3[%c37_37] : memref<84xf32, #tpu.memory_space<smem>>
    %c38_38 = arith.constant 38 : index
    %80 = memref.load %arg3[%c38_38] : memref<84xf32, #tpu.memory_space<smem>>
    %c39_39 = arith.constant 39 : index
    %81 = memref.load %arg3[%c39_39] : memref<84xf32, #tpu.memory_space<smem>>
    %c40_40 = arith.constant 40 : index
    %82 = memref.load %arg3[%c40_40] : memref<84xf32, #tpu.memory_space<smem>>
    %c41_41 = arith.constant 41 : index
    %83 = memref.load %arg3[%c41_41] : memref<84xf32, #tpu.memory_space<smem>>
    %c42 = arith.constant 42 : index
    %84 = memref.load %arg3[%c42] : memref<84xf32, #tpu.memory_space<smem>>
    %c43 = arith.constant 43 : index
    %85 = memref.load %arg3[%c43] : memref<84xf32, #tpu.memory_space<smem>>
    %c44 = arith.constant 44 : index
    %86 = memref.load %arg3[%c44] : memref<84xf32, #tpu.memory_space<smem>>
    %c45 = arith.constant 45 : index
    %87 = memref.load %arg3[%c45] : memref<84xf32, #tpu.memory_space<smem>>
    %c46 = arith.constant 46 : index
    %88 = memref.load %arg3[%c46] : memref<84xf32, #tpu.memory_space<smem>>
    %c47 = arith.constant 47 : index
    %89 = memref.load %arg3[%c47] : memref<84xf32, #tpu.memory_space<smem>>
    %c48 = arith.constant 48 : index
    %90 = memref.load %arg3[%c48] : memref<84xf32, #tpu.memory_space<smem>>
    %c49 = arith.constant 49 : index
    %91 = memref.load %arg3[%c49] : memref<84xf32, #tpu.memory_space<smem>>
    %c50 = arith.constant 50 : index
    %92 = memref.load %arg3[%c50] : memref<84xf32, #tpu.memory_space<smem>>
    %c51 = arith.constant 51 : index
    %93 = memref.load %arg3[%c51] : memref<84xf32, #tpu.memory_space<smem>>
    %c52 = arith.constant 52 : index
    %94 = memref.load %arg3[%c52] : memref<84xf32, #tpu.memory_space<smem>>
    %c53 = arith.constant 53 : index
    %95 = memref.load %arg3[%c53] : memref<84xf32, #tpu.memory_space<smem>>
    %c54 = arith.constant 54 : index
    %96 = memref.load %arg3[%c54] : memref<84xf32, #tpu.memory_space<smem>>
    %c55 = arith.constant 55 : index
    %97 = memref.load %arg3[%c55] : memref<84xf32, #tpu.memory_space<smem>>
    %c56 = arith.constant 56 : index
    %98 = memref.load %arg3[%c56] : memref<84xf32, #tpu.memory_space<smem>>
    %c57 = arith.constant 57 : index
    %99 = memref.load %arg3[%c57] : memref<84xf32, #tpu.memory_space<smem>>
    %c58 = arith.constant 58 : index
    %100 = memref.load %arg3[%c58] : memref<84xf32, #tpu.memory_space<smem>>
    %c59 = arith.constant 59 : index
    %101 = memref.load %arg3[%c59] : memref<84xf32, #tpu.memory_space<smem>>
    %c60 = arith.constant 60 : index
    %102 = memref.load %arg3[%c60] : memref<84xf32, #tpu.memory_space<smem>>
    %c61 = arith.constant 61 : index
    %103 = memref.load %arg3[%c61] : memref<84xf32, #tpu.memory_space<smem>>
    %c62 = arith.constant 62 : index
    %104 = memref.load %arg3[%c62] : memref<84xf32, #tpu.memory_space<smem>>
    %c63 = arith.constant 63 : index
    %105 = memref.load %arg3[%c63] : memref<84xf32, #tpu.memory_space<smem>>
    %c64 = arith.constant 64 : index
    %106 = memref.load %arg3[%c64] : memref<84xf32, #tpu.memory_space<smem>>
    %c65 = arith.constant 65 : index
    %107 = memref.load %arg3[%c65] : memref<84xf32, #tpu.memory_space<smem>>
    %c66 = arith.constant 66 : index
    %108 = memref.load %arg3[%c66] : memref<84xf32, #tpu.memory_space<smem>>
    %c67 = arith.constant 67 : index
    %109 = memref.load %arg3[%c67] : memref<84xf32, #tpu.memory_space<smem>>
    %c68 = arith.constant 68 : index
    %110 = memref.load %arg3[%c68] : memref<84xf32, #tpu.memory_space<smem>>
    %c69 = arith.constant 69 : index
    %111 = memref.load %arg3[%c69] : memref<84xf32, #tpu.memory_space<smem>>
    %c70 = arith.constant 70 : index
    %112 = memref.load %arg3[%c70] : memref<84xf32, #tpu.memory_space<smem>>
    %c71 = arith.constant 71 : index
    %113 = memref.load %arg3[%c71] : memref<84xf32, #tpu.memory_space<smem>>
    %c72 = arith.constant 72 : index
    %114 = memref.load %arg3[%c72] : memref<84xf32, #tpu.memory_space<smem>>
    %c73 = arith.constant 73 : index
    %115 = memref.load %arg3[%c73] : memref<84xf32, #tpu.memory_space<smem>>
    %c74 = arith.constant 74 : index
    %116 = memref.load %arg3[%c74] : memref<84xf32, #tpu.memory_space<smem>>
    %c75 = arith.constant 75 : index
    %117 = memref.load %arg3[%c75] : memref<84xf32, #tpu.memory_space<smem>>
    %c76 = arith.constant 76 : index
    %118 = memref.load %arg3[%c76] : memref<84xf32, #tpu.memory_space<smem>>
    %c77 = arith.constant 77 : index
    %119 = memref.load %arg3[%c77] : memref<84xf32, #tpu.memory_space<smem>>
    %c78 = arith.constant 78 : index
    %120 = memref.load %arg3[%c78] : memref<84xf32, #tpu.memory_space<smem>>
    %c79 = arith.constant 79 : index
    %121 = memref.load %arg3[%c79] : memref<84xf32, #tpu.memory_space<smem>>
    %c80 = arith.constant 80 : index
    %122 = memref.load %arg3[%c80] : memref<84xf32, #tpu.memory_space<smem>>
    %c81 = arith.constant 81 : index
    %123 = memref.load %arg3[%c81] : memref<84xf32, #tpu.memory_space<smem>>
    %c82 = arith.constant 82 : index
    %124 = memref.load %arg3[%c82] : memref<84xf32, #tpu.memory_space<smem>>
    %c83 = arith.constant 83 : index
    %125 = memref.load %arg3[%c83] : memref<84xf32, #tpu.memory_space<smem>>
    %c0_42 = arith.constant 0 : index
    %126 = memref.load %arg2[%c0_42] : memref<14xf32, #tpu.memory_space<smem>>
    %127 = vector.broadcast %126 : f32 to vector<8x128xf32>
    %c1_43 = arith.constant 1 : index
    %128 = memref.load %arg2[%c1_43] : memref<14xf32, #tpu.memory_space<smem>>
    %129 = vector.broadcast %128 : f32 to vector<8x128xf32>
    %c2_44 = arith.constant 2 : index
    %130 = memref.load %arg2[%c2_44] : memref<14xf32, #tpu.memory_space<smem>>
    %131 = vector.broadcast %130 : f32 to vector<8x128xf32>
    %c3_45 = arith.constant 3 : index
    %132 = memref.load %arg2[%c3_45] : memref<14xf32, #tpu.memory_space<smem>>
    %133 = vector.broadcast %132 : f32 to vector<8x128xf32>
    %c4_46 = arith.constant 4 : index
    %134 = memref.load %arg2[%c4_46] : memref<14xf32, #tpu.memory_space<smem>>
    %135 = vector.broadcast %134 : f32 to vector<8x128xf32>
    %c5_47 = arith.constant 5 : index
    %136 = memref.load %arg2[%c5_47] : memref<14xf32, #tpu.memory_space<smem>>
    %137 = vector.broadcast %136 : f32 to vector<8x128xf32>
    %c6_48 = arith.constant 6 : index
    %138 = memref.load %arg2[%c6_48] : memref<14xf32, #tpu.memory_space<smem>>
    %139 = vector.broadcast %138 : f32 to vector<8x128xf32>
    %c7_49 = arith.constant 7 : index
    %140 = memref.load %arg2[%c7_49] : memref<14xf32, #tpu.memory_space<smem>>
    %141 = vector.broadcast %140 : f32 to vector<8x128xf32>
    %c8_50 = arith.constant 8 : index
    %142 = memref.load %arg2[%c8_50] : memref<14xf32, #tpu.memory_space<smem>>
    %143 = vector.broadcast %142 : f32 to vector<8x128xf32>
    %c9_51 = arith.constant 9 : index
    %144 = memref.load %arg2[%c9_51] : memref<14xf32, #tpu.memory_space<smem>>
    %145 = vector.broadcast %144 : f32 to vector<8x128xf32>
    %c10_52 = arith.constant 10 : index
    %146 = memref.load %arg2[%c10_52] : memref<14xf32, #tpu.memory_space<smem>>
    %147 = vector.broadcast %146 : f32 to vector<8x128xf32>
    %c11_53 = arith.constant 11 : index
    %148 = memref.load %arg2[%c11_53] : memref<14xf32, #tpu.memory_space<smem>>
    %149 = vector.broadcast %148 : f32 to vector<8x128xf32>
    %c12_54 = arith.constant 12 : index
    %150 = memref.load %arg2[%c12_54] : memref<14xf32, #tpu.memory_space<smem>>
    %151 = vector.broadcast %150 : f32 to vector<8x128xf32>
    %c13_55 = arith.constant 13 : index
    %152 = memref.load %arg2[%c13_55] : memref<14xf32, #tpu.memory_space<smem>>
    %153 = vector.broadcast %152 : f32 to vector<8x128xf32>
    %c0_56 = arith.constant 0 : index
    %154 = memref.load %arg4[%c0_56] : memref<12xf32, #tpu.memory_space<smem>>
    %155 = vector.broadcast %154 : f32 to vector<8x128xf32>
    %c1_57 = arith.constant 1 : index
    %156 = memref.load %arg4[%c1_57] : memref<12xf32, #tpu.memory_space<smem>>
    %157 = vector.broadcast %156 : f32 to vector<8x128xf32>
    %c2_58 = arith.constant 2 : index
    %158 = memref.load %arg4[%c2_58] : memref<12xf32, #tpu.memory_space<smem>>
    %159 = vector.broadcast %158 : f32 to vector<8x128xf32>
    %c3_59 = arith.constant 3 : index
    %160 = memref.load %arg4[%c3_59] : memref<12xf32, #tpu.memory_space<smem>>
    %161 = vector.broadcast %160 : f32 to vector<8x128xf32>
    %c4_60 = arith.constant 4 : index
    %162 = memref.load %arg4[%c4_60] : memref<12xf32, #tpu.memory_space<smem>>
    %163 = vector.broadcast %162 : f32 to vector<8x128xf32>
    %c5_61 = arith.constant 5 : index
    %164 = memref.load %arg4[%c5_61] : memref<12xf32, #tpu.memory_space<smem>>
    %165 = vector.broadcast %164 : f32 to vector<8x128xf32>
    %c6_62 = arith.constant 6 : index
    %166 = memref.load %arg4[%c6_62] : memref<12xf32, #tpu.memory_space<smem>>
    %167 = vector.broadcast %166 : f32 to vector<8x128xf32>
    %c7_63 = arith.constant 7 : index
    %168 = memref.load %arg4[%c7_63] : memref<12xf32, #tpu.memory_space<smem>>
    %169 = vector.broadcast %168 : f32 to vector<8x128xf32>
    %c8_64 = arith.constant 8 : index
    %170 = memref.load %arg4[%c8_64] : memref<12xf32, #tpu.memory_space<smem>>
    %171 = vector.broadcast %170 : f32 to vector<8x128xf32>
    %c9_65 = arith.constant 9 : index
    %172 = memref.load %arg4[%c9_65] : memref<12xf32, #tpu.memory_space<smem>>
    %173 = vector.broadcast %172 : f32 to vector<8x128xf32>
    %c10_66 = arith.constant 10 : index
    %174 = memref.load %arg4[%c10_66] : memref<12xf32, #tpu.memory_space<smem>>
    %175 = vector.broadcast %174 : f32 to vector<8x128xf32>
    %c11_67 = arith.constant 11 : index
    %176 = memref.load %arg4[%c11_67] : memref<12xf32, #tpu.memory_space<smem>>
    %177 = vector.broadcast %176 : f32 to vector<8x128xf32>
    %c0_i32 = arith.constant 0 : i32
    %c8_i32 = arith.constant 8 : i32
    %178 = arith.muli %c0_i32, %c8_i32 : i32
    %179 = tpu.assume_multiple %178, 8 : i32
    %c0_68 = arith.constant 0 : index
    %180 = arith.index_cast %179 : i32 to index
    %c0_69 = arith.constant 0 : index
    %181 = vector.load %arg5[%c0_68, %180, %c0_69] : memref<3x8x128xf32, #tpu.memory_space<vmem>>, vector<1x8x128xf32>
    %182 = vector.shape_cast %181 : vector<1x8x128xf32> to vector<8x128xf32>
    %c1_70 = arith.constant 1 : index
    %183 = arith.index_cast %179 : i32 to index
    %c0_71 = arith.constant 0 : index
    %184 = vector.load %arg5[%c1_70, %183, %c0_71] : memref<3x8x128xf32, #tpu.memory_space<vmem>>, vector<1x8x128xf32>
    %185 = vector.shape_cast %184 : vector<1x8x128xf32> to vector<8x128xf32>
    %c2_72 = arith.constant 2 : index
    %186 = arith.index_cast %179 : i32 to index
    %c0_73 = arith.constant 0 : index
    %187 = vector.load %arg5[%c2_72, %186, %c0_73] : memref<3x8x128xf32, #tpu.memory_space<vmem>>, vector<1x8x128xf32>
    %188 = vector.shape_cast %187 : vector<1x8x128xf32> to vector<8x128xf32>
    %189 = vector.broadcast %0 : f32 to vector<8x128xf32>
    %190 = arith.mulf %189, %182 : vector<8x128xf32>
    %191 = arith.addf %127, %190 : vector<8x128xf32>
    %192 = vector.broadcast %1 : f32 to vector<8x128xf32>
    %193 = arith.mulf %192, %185 : vector<8x128xf32>
    %194 = arith.addf %191, %193 : vector<8x128xf32>
    %195 = vector.broadcast %2 : f32 to vector<8x128xf32>
    %196 = arith.mulf %195, %188 : vector<8x128xf32>
    %197 = arith.addf %194, %196 : vector<8x128xf32>
    %cst = arith.constant 0.000000e+00 : f32
    %198 = vector.broadcast %cst : f32 to vector<8x128xf32>
    %199 = arith.maximumf %197, %198 : vector<8x128xf32>
    %200 = vector.broadcast %3 : f32 to vector<8x128xf32>
    %201 = arith.mulf %200, %182 : vector<8x128xf32>
    %202 = arith.addf %129, %201 : vector<8x128xf32>
    %203 = vector.broadcast %4 : f32 to vector<8x128xf32>
    %204 = arith.mulf %203, %185 : vector<8x128xf32>
    %205 = arith.addf %202, %204 : vector<8x128xf32>
    %206 = vector.broadcast %5 : f32 to vector<8x128xf32>
    %207 = arith.mulf %206, %188 : vector<8x128xf32>
    %208 = arith.addf %205, %207 : vector<8x128xf32>
    %cst_74 = arith.constant 0.000000e+00 : f32
    %209 = vector.broadcast %cst_74 : f32 to vector<8x128xf32>
    %210 = arith.maximumf %208, %209 : vector<8x128xf32>
    %211 = vector.broadcast %6 : f32 to vector<8x128xf32>
    %212 = arith.mulf %211, %182 : vector<8x128xf32>
    %213 = arith.addf %131, %212 : vector<8x128xf32>
    %214 = vector.broadcast %7 : f32 to vector<8x128xf32>
    %215 = arith.mulf %214, %185 : vector<8x128xf32>
    %216 = arith.addf %213, %215 : vector<8x128xf32>
    %217 = vector.broadcast %8 : f32 to vector<8x128xf32>
    %218 = arith.mulf %217, %188 : vector<8x128xf32>
    %219 = arith.addf %216, %218 : vector<8x128xf32>
    %cst_75 = arith.constant 0.000000e+00 : f32
    %220 = vector.broadcast %cst_75 : f32 to vector<8x128xf32>
    %221 = arith.maximumf %219, %220 : vector<8x128xf32>
    %222 = vector.broadcast %9 : f32 to vector<8x128xf32>
    %223 = arith.mulf %222, %182 : vector<8x128xf32>
    %224 = arith.addf %133, %223 : vector<8x128xf32>
    %225 = vector.broadcast %10 : f32 to vector<8x128xf32>
    %226 = arith.mulf %225, %185 : vector<8x128xf32>
    %227 = arith.addf %224, %226 : vector<8x128xf32>
    %228 = vector.broadcast %11 : f32 to vector<8x128xf32>
    %229 = arith.mulf %228, %188 : vector<8x128xf32>
    %230 = arith.addf %227, %229 : vector<8x128xf32>
    %cst_76 = arith.constant 0.000000e+00 : f32
    %231 = vector.broadcast %cst_76 : f32 to vector<8x128xf32>
    %232 = arith.maximumf %230, %231 : vector<8x128xf32>
    %233 = vector.broadcast %12 : f32 to vector<8x128xf32>
    %234 = arith.mulf %233, %182 : vector<8x128xf32>
    %235 = arith.addf %135, %234 : vector<8x128xf32>
    %236 = vector.broadcast %13 : f32 to vector<8x128xf32>
    %237 = arith.mulf %236, %185 : vector<8x128xf32>
    %238 = arith.addf %235, %237 : vector<8x128xf32>
    %239 = vector.broadcast %14 : f32 to vector<8x128xf32>
    %240 = arith.mulf %239, %188 : vector<8x128xf32>
    %241 = arith.addf %238, %240 : vector<8x128xf32>
    %cst_77 = arith.constant 0.000000e+00 : f32
    %242 = vector.broadcast %cst_77 : f32 to vector<8x128xf32>
    %243 = arith.maximumf %241, %242 : vector<8x128xf32>
    %244 = vector.broadcast %15 : f32 to vector<8x128xf32>
    %245 = arith.mulf %244, %182 : vector<8x128xf32>
    %246 = arith.addf %137, %245 : vector<8x128xf32>
    %247 = vector.broadcast %16 : f32 to vector<8x128xf32>
    %248 = arith.mulf %247, %185 : vector<8x128xf32>
    %249 = arith.addf %246, %248 : vector<8x128xf32>
    %250 = vector.broadcast %17 : f32 to vector<8x128xf32>
    %251 = arith.mulf %250, %188 : vector<8x128xf32>
    %252 = arith.addf %249, %251 : vector<8x128xf32>
    %cst_78 = arith.constant 0.000000e+00 : f32
    %253 = vector.broadcast %cst_78 : f32 to vector<8x128xf32>
    %254 = arith.maximumf %252, %253 : vector<8x128xf32>
    %255 = vector.broadcast %18 : f32 to vector<8x128xf32>
    %256 = arith.mulf %255, %182 : vector<8x128xf32>
    %257 = arith.addf %139, %256 : vector<8x128xf32>
    %258 = vector.broadcast %19 : f32 to vector<8x128xf32>
    %259 = arith.mulf %258, %185 : vector<8x128xf32>
    %260 = arith.addf %257, %259 : vector<8x128xf32>
    %261 = vector.broadcast %20 : f32 to vector<8x128xf32>
    %262 = arith.mulf %261, %188 : vector<8x128xf32>
    %263 = arith.addf %260, %262 : vector<8x128xf32>
    %cst_79 = arith.constant 0.000000e+00 : f32
    %264 = vector.broadcast %cst_79 : f32 to vector<8x128xf32>
    %265 = arith.maximumf %263, %264 : vector<8x128xf32>
    %266 = vector.broadcast %21 : f32 to vector<8x128xf32>
    %267 = arith.mulf %266, %182 : vector<8x128xf32>
    %268 = arith.addf %141, %267 : vector<8x128xf32>
    %269 = vector.broadcast %22 : f32 to vector<8x128xf32>
    %270 = arith.mulf %269, %185 : vector<8x128xf32>
    %271 = arith.addf %268, %270 : vector<8x128xf32>
    %272 = vector.broadcast %23 : f32 to vector<8x128xf32>
    %273 = arith.mulf %272, %188 : vector<8x128xf32>
    %274 = arith.addf %271, %273 : vector<8x128xf32>
    %cst_80 = arith.constant 0.000000e+00 : f32
    %275 = vector.broadcast %cst_80 : f32 to vector<8x128xf32>
    %276 = arith.maximumf %274, %275 : vector<8x128xf32>
    %277 = vector.broadcast %24 : f32 to vector<8x128xf32>
    %278 = arith.mulf %277, %182 : vector<8x128xf32>
    %279 = arith.addf %143, %278 : vector<8x128xf32>
    %280 = vector.broadcast %25 : f32 to vector<8x128xf32>
    %281 = arith.mulf %280, %185 : vector<8x128xf32>
    %282 = arith.addf %279, %281 : vector<8x128xf32>
    %283 = vector.broadcast %26 : f32 to vector<8x128xf32>
    %284 = arith.mulf %283, %188 : vector<8x128xf32>
    %285 = arith.addf %282, %284 : vector<8x128xf32>
    %cst_81 = arith.constant 0.000000e+00 : f32
    %286 = vector.broadcast %cst_81 : f32 to vector<8x128xf32>
    %287 = arith.maximumf %285, %286 : vector<8x128xf32>
    %288 = vector.broadcast %27 : f32 to vector<8x128xf32>
    %289 = arith.mulf %288, %182 : vector<8x128xf32>
    %290 = arith.addf %145, %289 : vector<8x128xf32>
    %291 = vector.broadcast %28 : f32 to vector<8x128xf32>
    %292 = arith.mulf %291, %185 : vector<8x128xf32>
    %293 = arith.addf %290, %292 : vector<8x128xf32>
    %294 = vector.broadcast %29 : f32 to vector<8x128xf32>
    %295 = arith.mulf %294, %188 : vector<8x128xf32>
    %296 = arith.addf %293, %295 : vector<8x128xf32>
    %cst_82 = arith.constant 0.000000e+00 : f32
    %297 = vector.broadcast %cst_82 : f32 to vector<8x128xf32>
    %298 = arith.maximumf %296, %297 : vector<8x128xf32>
    %299 = vector.broadcast %30 : f32 to vector<8x128xf32>
    %300 = arith.mulf %299, %182 : vector<8x128xf32>
    %301 = arith.addf %147, %300 : vector<8x128xf32>
    %302 = vector.broadcast %31 : f32 to vector<8x128xf32>
    %303 = arith.mulf %302, %185 : vector<8x128xf32>
    %304 = arith.addf %301, %303 : vector<8x128xf32>
    %305 = vector.broadcast %32 : f32 to vector<8x128xf32>
    %306 = arith.mulf %305, %188 : vector<8x128xf32>
    %307 = arith.addf %304, %306 : vector<8x128xf32>
    %cst_83 = arith.constant 0.000000e+00 : f32
    %308 = vector.broadcast %cst_83 : f32 to vector<8x128xf32>
    %309 = arith.maximumf %307, %308 : vector<8x128xf32>
    %310 = vector.broadcast %33 : f32 to vector<8x128xf32>
    %311 = arith.mulf %310, %182 : vector<8x128xf32>
    %312 = arith.addf %149, %311 : vector<8x128xf32>
    %313 = vector.broadcast %34 : f32 to vector<8x128xf32>
    %314 = arith.mulf %313, %185 : vector<8x128xf32>
    %315 = arith.addf %312, %314 : vector<8x128xf32>
    %316 = vector.broadcast %35 : f32 to vector<8x128xf32>
    %317 = arith.mulf %316, %188 : vector<8x128xf32>
    %318 = arith.addf %315, %317 : vector<8x128xf32>
    %cst_84 = arith.constant 0.000000e+00 : f32
    %319 = vector.broadcast %cst_84 : f32 to vector<8x128xf32>
    %320 = arith.maximumf %318, %319 : vector<8x128xf32>
    %321 = vector.broadcast %36 : f32 to vector<8x128xf32>
    %322 = arith.mulf %321, %182 : vector<8x128xf32>
    %323 = arith.addf %151, %322 : vector<8x128xf32>
    %324 = vector.broadcast %37 : f32 to vector<8x128xf32>
    %325 = arith.mulf %324, %185 : vector<8x128xf32>
    %326 = arith.addf %323, %325 : vector<8x128xf32>
    %327 = vector.broadcast %38 : f32 to vector<8x128xf32>
    %328 = arith.mulf %327, %188 : vector<8x128xf32>
    %329 = arith.addf %326, %328 : vector<8x128xf32>
    %cst_85 = arith.constant 0.000000e+00 : f32
    %330 = vector.broadcast %cst_85 : f32 to vector<8x128xf32>
    %331 = arith.maximumf %329, %330 : vector<8x128xf32>
    %332 = vector.broadcast %39 : f32 to vector<8x128xf32>
    %333 = arith.mulf %332, %182 : vector<8x128xf32>
    %334 = arith.addf %153, %333 : vector<8x128xf32>
    %335 = vector.broadcast %40 : f32 to vector<8x128xf32>
    %336 = arith.mulf %335, %185 : vector<8x128xf32>
    %337 = arith.addf %334, %336 : vector<8x128xf32>
    %338 = vector.broadcast %41 : f32 to vector<8x128xf32>
    %339 = arith.mulf %338, %188 : vector<8x128xf32>
    %340 = arith.addf %337, %339 : vector<8x128xf32>
    %cst_86 = arith.constant 0.000000e+00 : f32
    %341 = vector.broadcast %cst_86 : f32 to vector<8x128xf32>
    %342 = arith.maximumf %340, %341 : vector<8x128xf32>
    %343 = vector.broadcast %42 : f32 to vector<8x128xf32>
    %344 = arith.mulf %343, %199 : vector<8x128xf32>
    %345 = arith.addf %155, %344 : vector<8x128xf32>
    %346 = vector.broadcast %43 : f32 to vector<8x128xf32>
    %347 = arith.mulf %346, %210 : vector<8x128xf32>
    %348 = arith.addf %345, %347 : vector<8x128xf32>
    %349 = vector.broadcast %44 : f32 to vector<8x128xf32>
    %350 = arith.mulf %349, %221 : vector<8x128xf32>
    %351 = arith.addf %348, %350 : vector<8x128xf32>
    %352 = vector.broadcast %45 : f32 to vector<8x128xf32>
    %353 = arith.mulf %352, %232 : vector<8x128xf32>
    %354 = arith.addf %351, %353 : vector<8x128xf32>
    %355 = vector.broadcast %46 : f32 to vector<8x128xf32>
    %356 = arith.mulf %355, %243 : vector<8x128xf32>
    %357 = arith.addf %354, %356 : vector<8x128xf32>
    %358 = vector.broadcast %47 : f32 to vector<8x128xf32>
    %359 = arith.mulf %358, %254 : vector<8x128xf32>
    %360 = arith.addf %357, %359 : vector<8x128xf32>
    %361 = vector.broadcast %48 : f32 to vector<8x128xf32>
    %362 = arith.mulf %361, %265 : vector<8x128xf32>
    %363 = arith.addf %360, %362 : vector<8x128xf32>
    %c0_87 = arith.constant 0 : index
    %364 = arith.index_cast %179 : i32 to index
    %c0_88 = arith.constant 0 : index
    %365 = vector.load %arg6[%c0_87, %364, %c0_88] : memref<12x8x128xf32, #tpu.memory_space<vmem>>, vector<1x8x128xf32>
    %366 = vector.shape_cast %365 : vector<1x8x128xf32> to vector<8x128xf32>
    %367 = vector.shape_cast %363 : vector<8x128xf32> to vector<1x8x128xf32>
    tpu.vector_store %arg6[%c0_87, %364, %c0_88], %367 {strides = array<i32>} : memref<12x8x128xf32, #tpu.memory_space<vmem>>, vector<1x8x128xf32>,
    %368 = vector.broadcast %49 : f32 to vector<8x128xf32>
    %369 = arith.mulf %368, %199 : vector<8x128xf32>
    %370 = arith.addf %157, %369 : vector<8x128xf32>
    %371 = vector.broadcast %50 : f32 to vector<8x128xf32>
    %372 = arith.mulf %371, %210 : vector<8x128xf32>
    %373 = arith.addf %370, %372 : vector<8x128xf32>
    %374 = vector.broadcast %51 : f32 to vector<8x128xf32>
    %375 = arith.mulf %374, %221 : vector<8x128xf32>
    %376 = arith.addf %373, %375 : vector<8x128xf32>
    %377 = vector.broadcast %52 : f32 to vector<8x128xf32>
    %378 = arith.mulf %377, %232 : vector<8x128xf32>
    %379 = arith.addf %376, %378 : vector<8x128xf32>
    %380 = vector.broadcast %53 : f32 to vector<8x128xf32>
    %381 = arith.mulf %380, %243 : vector<8x128xf32>
    %382 = arith.addf %379, %381 : vector<8x128xf32>
    %383 = vector.broadcast %54 : f32 to vector<8x128xf32>
    %384 = arith.mulf %383, %254 : vector<8x128xf32>
    %385 = arith.addf %382, %384 : vector<8x128xf32>
    %386 = vector.broadcast %55 : f32 to vector<8x128xf32>
    %387 = arith.mulf %386, %265 : vector<8x128xf32>
    %388 = arith.addf %385, %387 : vector<8x128xf32>
    %c1_89 = arith.constant 1 : index
    %389 = arith.index_cast %179 : i32 to index
    %c0_90 = arith.constant 0 : index
    %390 = vector.load %arg6[%c1_89, %389, %c0_90] : memref<12x8x128xf32, #tpu.memory_space<vmem>>, vector<1x8x128xf32>
    %391 = vector.shape_cast %390 : vector<1x8x128xf32> to vector<8x128xf32>
    %392 = vector.shape_cast %388 : vector<8x128xf32> to vector<1x8x128xf32>
    tpu.vector_store %arg6[%c1_89, %389, %c0_90], %392 {strides = array<i32>} : memref<12x8x128xf32, #tpu.memory_space<vmem>>, vector<1x8x128xf32>,
    %393 = vector.broadcast %56 : f32 to vector<8x128xf32>
    %394 = arith.mulf %393, %199 : vector<8x128xf32>
    %395 = arith.addf %159, %394 : vector<8x128xf32>
    %396 = vector.broadcast %57 : f32 to vector<8x128xf32>
    %397 = arith.mulf %396, %210 : vector<8x128xf32>
    %398 = arith.addf %395, %397 : vector<8x128xf32>
    %399 = vector.broadcast %58 : f32 to vector<8x128xf32>
    %400 = arith.mulf %399, %221 : vector<8x128xf32>
    %401 = arith.addf %398, %400 : vector<8x128xf32>
    %402 = vector.broadcast %59 : f32 to vector<8x128xf32>
    %403 = arith.mulf %402, %232 : vector<8x128xf32>
    %404 = arith.addf %401, %403 : vector<8x128xf32>
    %405 = vector.broadcast %60 : f32 to vector<8x128xf32>
    %406 = arith.mulf %405, %243 : vector<8x128xf32>
    %407 = arith.addf %404, %406 : vector<8x128xf32>
    %408 = vector.broadcast %61 : f32 to vector<8x128xf32>
    %409 = arith.mulf %408, %254 : vector<8x128xf32>
    %410 = arith.addf %407, %409 : vector<8x128xf32>
    %411 = vector.broadcast %62 : f32 to vector<8x128xf32>
    %412 = arith.mulf %411, %265 : vector<8x128xf32>
    %413 = arith.addf %410, %412 : vector<8x128xf32>
    %c2_91 = arith.constant 2 : index
    %414 = arith.index_cast %179 : i32 to index
    %c0_92 = arith.constant 0 : index
    %415 = vector.load %arg6[%c2_91, %414, %c0_92] : memref<12x8x128xf32, #tpu.memory_space<vmem>>, vector<1x8x128xf32>
    %416 = vector.shape_cast %415 : vector<1x8x128xf32> to vector<8x128xf32>
    %417 = vector.shape_cast %413 : vector<8x128xf32> to vector<1x8x128xf32>
    tpu.vector_store %arg6[%c2_91, %414, %c0_92], %417 {strides = array<i32>} : memref<12x8x128xf32, #tpu.memory_space<vmem>>, vector<1x8x128xf32>,
    %418 = vector.broadcast %63 : f32 to vector<8x128xf32>
    %419 = arith.mulf %418, %199 : vector<8x128xf32>
    %420 = arith.addf %161, %419 : vector<8x128xf32>
    %421 = vector.broadcast %64 : f32 to vector<8x128xf32>
    %422 = arith.mulf %421, %210 : vector<8x128xf32>
    %423 = arith.addf %420, %422 : vector<8x128xf32>
    %424 = vector.broadcast %65 : f32 to vector<8x128xf32>
    %425 = arith.mulf %424, %221 : vector<8x128xf32>
    %426 = arith.addf %423, %425 : vector<8x128xf32>
    %427 = vector.broadcast %66 : f32 to vector<8x128xf32>
    %428 = arith.mulf %427, %232 : vector<8x128xf32>
    %429 = arith.addf %426, %428 : vector<8x128xf32>
    %430 = vector.broadcast %67 : f32 to vector<8x128xf32>
    %431 = arith.mulf %430, %243 : vector<8x128xf32>
    %432 = arith.addf %429, %431 : vector<8x128xf32>
    %433 = vector.broadcast %68 : f32 to vector<8x128xf32>
    %434 = arith.mulf %433, %254 : vector<8x128xf32>
    %435 = arith.addf %432, %434 : vector<8x128xf32>
    %436 = vector.broadcast %69 : f32 to vector<8x128xf32>
    %437 = arith.mulf %436, %265 : vector<8x128xf32>
    %438 = arith.addf %435, %437 : vector<8x128xf32>
    %c3_93 = arith.constant 3 : index
    %439 = arith.index_cast %179 : i32 to index
    %c0_94 = arith.constant 0 : index
    %440 = vector.load %arg6[%c3_93, %439, %c0_94] : memref<12x8x128xf32, #tpu.memory_space<vmem>>, vector<1x8x128xf32>
    %441 = vector.shape_cast %440 : vector<1x8x128xf32> to vector<8x128xf32>
    %442 = vector.shape_cast %438 : vector<8x128xf32> to vector<1x8x128xf32>
    tpu.vector_store %arg6[%c3_93, %439, %c0_94], %442 {strides = array<i32>} : memref<12x8x128xf32, #tpu.memory_space<vmem>>, vector<1x8x128xf32>,
    %443 = vector.broadcast %70 : f32 to vector<8x128xf32>
    %444 = arith.mulf %443, %199 : vector<8x128xf32>
    %445 = arith.addf %163, %444 : vector<8x128xf32>
    %446 = vector.broadcast %71 : f32 to vector<8x128xf32>
    %447 = arith.mulf %446, %210 : vector<8x128xf32>
    %448 = arith.addf %445, %447 : vector<8x128xf32>
    %449 = vector.broadcast %72 : f32 to vector<8x128xf32>
    %450 = arith.mulf %449, %221 : vector<8x128xf32>
    %451 = arith.addf %448, %450 : vector<8x128xf32>
    %452 = vector.broadcast %73 : f32 to vector<8x128xf32>
    %453 = arith.mulf %452, %232 : vector<8x128xf32>
    %454 = arith.addf %451, %453 : vector<8x128xf32>
    %455 = vector.broadcast %74 : f32 to vector<8x128xf32>
    %456 = arith.mulf %455, %243 : vector<8x128xf32>
    %457 = arith.addf %454, %456 : vector<8x128xf32>
    %458 = vector.broadcast %75 : f32 to vector<8x128xf32>
    %459 = arith.mulf %458, %254 : vector<8x128xf32>
    %460 = arith.addf %457, %459 : vector<8x128xf32>
    %461 = vector.broadcast %76 : f32 to vector<8x128xf32>
    %462 = arith.mulf %461, %265 : vector<8x128xf32>
    %463 = arith.addf %460, %462 : vector<8x128xf32>
    %c4_95 = arith.constant 4 : index
    %464 = arith.index_cast %179 : i32 to index
    %c0_96 = arith.constant 0 : index
    %465 = vector.load %arg6[%c4_95, %464, %c0_96] : memref<12x8x128xf32, #tpu.memory_space<vmem>>, vector<1x8x128xf32>
    %466 = vector.shape_cast %465 : vector<1x8x128xf32> to vector<8x128xf32>
    %467 = vector.shape_cast %463 : vector<8x128xf32> to vector<1x8x128xf32>
    tpu.vector_store %arg6[%c4_95, %464, %c0_96], %467 {strides = array<i32>} : memref<12x8x128xf32, #tpu.memory_space<vmem>>, vector<1x8x128xf32>,
    %468 = vector.broadcast %77 : f32 to vector<8x128xf32>
    %469 = arith.mulf %468, %199 : vector<8x128xf32>
    %470 = arith.addf %165, %469 : vector<8x128xf32>
    %471 = vector.broadcast %78 : f32 to vector<8x128xf32>
    %472 = arith.mulf %471, %210 : vector<8x128xf32>
    %473 = arith.addf %470, %472 : vector<8x128xf32>
    %474 = vector.broadcast %79 : f32 to vector<8x128xf32>
    %475 = arith.mulf %474, %221 : vector<8x128xf32>
    %476 = arith.addf %473, %475 : vector<8x128xf32>
    %477 = vector.broadcast %80 : f32 to vector<8x128xf32>
    %478 = arith.mulf %477, %232 : vector<8x128xf32>
    %479 = arith.addf %476, %478 : vector<8x128xf32>
    %480 = vector.broadcast %81 : f32 to vector<8x128xf32>
    %481 = arith.mulf %480, %243 : vector<8x128xf32>
    %482 = arith.addf %479, %481 : vector<8x128xf32>
    %483 = vector.broadcast %82 : f32 to vector<8x128xf32>
    %484 = arith.mulf %483, %254 : vector<8x128xf32>
    %485 = arith.addf %482, %484 : vector<8x128xf32>
    %486 = vector.broadcast %83 : f32 to vector<8x128xf32>
    %487 = arith.mulf %486, %265 : vector<8x128xf32>
    %488 = arith.addf %485, %487 : vector<8x128xf32>
    %c5_97 = arith.constant 5 : index
    %489 = arith.index_cast %179 : i32 to index
    %c0_98 = arith.constant 0 : index
    %490 = vector.load %arg6[%c5_97, %489, %c0_98] : memref<12x8x128xf32, #tpu.memory_space<vmem>>, vector<1x8x128xf32>
    %491 = vector.shape_cast %490 : vector<1x8x128xf32> to vector<8x128xf32>
    %492 = vector.shape_cast %488 : vector<8x128xf32> to vector<1x8x128xf32>
    tpu.vector_store %arg6[%c5_97, %489, %c0_98], %492 {strides = array<i32>} : memref<12x8x128xf32, #tpu.memory_space<vmem>>, vector<1x8x128xf32>,
    %493 = vector.broadcast %84 : f32 to vector<8x128xf32>
    %494 = arith.mulf %493, %276 : vector<8x128xf32>
    %495 = arith.addf %167, %494 : vector<8x128xf32>
    %496 = vector.broadcast %85 : f32 to vector<8x128xf32>
    %497 = arith.mulf %496, %287 : vector<8x128xf32>
    %498 = arith.addf %495, %497 : vector<8x128xf32>
    %499 = vector.broadcast %86 : f32 to vector<8x128xf32>
    %500 = arith.mulf %499, %298 : vector<8x128xf32>
    %501 = arith.addf %498, %500 : vector<8x128xf32>
    %502 = vector.broadcast %87 : f32 to vector<8x128xf32>
    %503 = arith.mulf %502, %309 : vector<8x128xf32>
    %504 = arith.addf %501, %503 : vector<8x128xf32>
    %505 = vector.broadcast %88 : f32 to vector<8x128xf32>
    %506 = arith.mulf %505, %320 : vector<8x128xf32>
    %507 = arith.addf %504, %506 : vector<8x128xf32>
    %508 = vector.broadcast %89 : f32 to vector<8x128xf32>
    %509 = arith.mulf %508, %331 : vector<8x128xf32>
    %510 = arith.addf %507, %509 : vector<8x128xf32>
    %511 = vector.broadcast %90 : f32 to vector<8x128xf32>
    %512 = arith.mulf %511, %342 : vector<8x128xf32>
    %513 = arith.addf %510, %512 : vector<8x128xf32>
    %c6_99 = arith.constant 6 : index
    %514 = arith.index_cast %179 : i32 to index
    %c0_100 = arith.constant 0 : index
    %515 = vector.load %arg6[%c6_99, %514, %c0_100] : memref<12x8x128xf32, #tpu.memory_space<vmem>>, vector<1x8x128xf32>
    %516 = vector.shape_cast %515 : vector<1x8x128xf32> to vector<8x128xf32>
    %517 = vector.shape_cast %513 : vector<8x128xf32> to vector<1x8x128xf32>
    tpu.vector_store %arg6[%c6_99, %514, %c0_100], %517 {strides = array<i32>} : memref<12x8x128xf32, #tpu.memory_space<vmem>>, vector<1x8x128xf32>,
    %518 = vector.broadcast %91 : f32 to vector<8x128xf32>
    %519 = arith.mulf %518, %276 : vector<8x128xf32>
    %520 = arith.addf %169, %519 : vector<8x128xf32>
    %521 = vector.broadcast %92 : f32 to vector<8x128xf32>
    %522 = arith.mulf %521, %287 : vector<8x128xf32>
    %523 = arith.addf %520, %522 : vector<8x128xf32>
    %524 = vector.broadcast %93 : f32 to vector<8x128xf32>
    %525 = arith.mulf %524, %298 : vector<8x128xf32>
    %526 = arith.addf %523, %525 : vector<8x128xf32>
    %527 = vector.broadcast %94 : f32 to vector<8x128xf32>
    %528 = arith.mulf %527, %309 : vector<8x128xf32>
    %529 = arith.addf %526, %528 : vector<8x128xf32>
    %530 = vector.broadcast %95 : f32 to vector<8x128xf32>
    %531 = arith.mulf %530, %320 : vector<8x128xf32>
    %532 = arith.addf %529, %531 : vector<8x128xf32>
    %533 = vector.broadcast %96 : f32 to vector<8x128xf32>
    %534 = arith.mulf %533, %331 : vector<8x128xf32>
    %535 = arith.addf %532, %534 : vector<8x128xf32>
    %536 = vector.broadcast %97 : f32 to vector<8x128xf32>
    %537 = arith.mulf %536, %342 : vector<8x128xf32>
    %538 = arith.addf %535, %537 : vector<8x128xf32>
    %c7_101 = arith.constant 7 : index
    %539 = arith.index_cast %179 : i32 to index
    %c0_102 = arith.constant 0 : index
    %540 = vector.load %arg6[%c7_101, %539, %c0_102] : memref<12x8x128xf32, #tpu.memory_space<vmem>>, vector<1x8x128xf32>
    %541 = vector.shape_cast %540 : vector<1x8x128xf32> to vector<8x128xf32>
    %542 = vector.shape_cast %538 : vector<8x128xf32> to vector<1x8x128xf32>
    tpu.vector_store %arg6[%c7_101, %539, %c0_102], %542 {strides = array<i32>} : memref<12x8x128xf32, #tpu.memory_space<vmem>>, vector<1x8x128xf32>,
    %543 = vector.broadcast %98 : f32 to vector<8x128xf32>
    %544 = arith.mulf %543, %276 : vector<8x128xf32>
    %545 = arith.addf %171, %544 : vector<8x128xf32>
    %546 = vector.broadcast %99 : f32 to vector<8x128xf32>
    %547 = arith.mulf %546, %287 : vector<8x128xf32>
    %548 = arith.addf %545, %547 : vector<8x128xf32>
    %549 = vector.broadcast %100 : f32 to vector<8x128xf32>
    %550 = arith.mulf %549, %298 : vector<8x128xf32>
    %551 = arith.addf %548, %550 : vector<8x128xf32>
    %552 = vector.broadcast %101 : f32 to vector<8x128xf32>
    %553 = arith.mulf %552, %309 : vector<8x128xf32>
    %554 = arith.addf %551, %553 : vector<8x128xf32>
    %555 = vector.broadcast %102 : f32 to vector<8x128xf32>
    %556 = arith.mulf %555, %320 : vector<8x128xf32>
    %557 = arith.addf %554, %556 : vector<8x128xf32>
    %558 = vector.broadcast %103 : f32 to vector<8x128xf32>
    %559 = arith.mulf %558, %331 : vector<8x128xf32>
    %560 = arith.addf %557, %559 : vector<8x128xf32>
    %561 = vector.broadcast %104 : f32 to vector<8x128xf32>
    %562 = arith.mulf %561, %342 : vector<8x128xf32>
    %563 = arith.addf %560, %562 : vector<8x128xf32>
    %c8_103 = arith.constant 8 : index
    %564 = arith.index_cast %179 : i32 to index
    %c0_104 = arith.constant 0 : index
    %565 = vector.load %arg6[%c8_103, %564, %c0_104] : memref<12x8x128xf32, #tpu.memory_space<vmem>>, vector<1x8x128xf32>
    %566 = vector.shape_cast %565 : vector<1x8x128xf32> to vector<8x128xf32>
    %567 = vector.shape_cast %563 : vector<8x128xf32> to vector<1x8x128xf32>
    tpu.vector_store %arg6[%c8_103, %564, %c0_104], %567 {strides = array<i32>} : memref<12x8x128xf32, #tpu.memory_space<vmem>>, vector<1x8x128xf32>,
    %568 = vector.broadcast %105 : f32 to vector<8x128xf32>
    %569 = arith.mulf %568, %276 : vector<8x128xf32>
    %570 = arith.addf %173, %569 : vector<8x128xf32>
    %571 = vector.broadcast %106 : f32 to vector<8x128xf32>
    %572 = arith.mulf %571, %287 : vector<8x128xf32>
    %573 = arith.addf %570, %572 : vector<8x128xf32>
    %574 = vector.broadcast %107 : f32 to vector<8x128xf32>
    %575 = arith.mulf %574, %298 : vector<8x128xf32>
    %576 = arith.addf %573, %575 : vector<8x128xf32>
    %577 = vector.broadcast %108 : f32 to vector<8x128xf32>
    %578 = arith.mulf %577, %309 : vector<8x128xf32>
    %579 = arith.addf %576, %578 : vector<8x128xf32>
    %580 = vector.broadcast %109 : f32 to vector<8x128xf32>
    %581 = arith.mulf %580, %320 : vector<8x128xf32>
    %582 = arith.addf %579, %581 : vector<8x128xf32>
    %583 = vector.broadcast %110 : f32 to vector<8x128xf32>
    %584 = arith.mulf %583, %331 : vector<8x128xf32>
    %585 = arith.addf %582, %584 : vector<8x128xf32>
    %586 = vector.broadcast %111 : f32 to vector<8x128xf32>
    %587 = arith.mulf %586, %342 : vector<8x128xf32>
    %588 = arith.addf %585, %587 : vector<8x128xf32>
    %c9_105 = arith.constant 9 : index
    %589 = arith.index_cast %179 : i32 to index
    %c0_106 = arith.constant 0 : index
    %590 = vector.load %arg6[%c9_105, %589, %c0_106] : memref<12x8x128xf32, #tpu.memory_space<vmem>>, vector<1x8x128xf32>
    %591 = vector.shape_cast %590 : vector<1x8x128xf32> to vector<8x128xf32>
    %592 = vector.shape_cast %588 : vector<8x128xf32> to vector<1x8x128xf32>
    tpu.vector_store %arg6[%c9_105, %589, %c0_106], %592 {strides = array<i32>} : memref<12x8x128xf32, #tpu.memory_space<vmem>>, vector<1x8x128xf32>,
    %593 = vector.broadcast %112 : f32 to vector<8x128xf32>
    %594 = arith.mulf %593, %276 : vector<8x128xf32>
    %595 = arith.addf %175, %594 : vector<8x128xf32>
    %596 = vector.broadcast %113 : f32 to vector<8x128xf32>
    %597 = arith.mulf %596, %287 : vector<8x128xf32>
    %598 = arith.addf %595, %597 : vector<8x128xf32>
    %599 = vector.broadcast %114 : f32 to vector<8x128xf32>
    %600 = arith.mulf %599, %298 : vector<8x128xf32>
    %601 = arith.addf %598, %600 : vector<8x128xf32>
    %602 = vector.broadcast %115 : f32 to vector<8x128xf32>
    %603 = arith.mulf %602, %309 : vector<8x128xf32>
    %604 = arith.addf %601, %603 : vector<8x128xf32>
    %605 = vector.broadcast %116 : f32 to vector<8x128xf32>
    %606 = arith.mulf %605, %320 : vector<8x128xf32>
    %607 = arith.addf %604, %606 : vector<8x128xf32>
    %608 = vector.broadcast %117 : f32 to vector<8x128xf32>
    %609 = arith.mulf %608, %331 : vector<8x128xf32>
    %610 = arith.addf %607, %609 : vector<8x128xf32>
    %611 = vector.broadcast %118 : f32 to vector<8x128xf32>
    %612 = arith.mulf %611, %342 : vector<8x128xf32>
    %613 = arith.addf %610, %612 : vector<8x128xf32>
    %c10_107 = arith.constant 10 : index
    %614 = arith.index_cast %179 : i32 to index
    %c0_108 = arith.constant 0 : index
    %615 = vector.load %arg6[%c10_107, %614, %c0_108] : memref<12x8x128xf32, #tpu.memory_space<vmem>>, vector<1x8x128xf32>
    %616 = vector.shape_cast %615 : vector<1x8x128xf32> to vector<8x128xf32>
    %617 = vector.shape_cast %613 : vector<8x128xf32> to vector<1x8x128xf32>
    tpu.vector_store %arg6[%c10_107, %614, %c0_108], %617 {strides = array<i32>} : memref<12x8x128xf32, #tpu.memory_space<vmem>>, vector<1x8x128xf32>,
    %618 = vector.broadcast %119 : f32 to vector<8x128xf32>
    %619 = arith.mulf %618, %276 : vector<8x128xf32>
    %620 = arith.addf %177, %619 : vector<8x128xf32>
    %621 = vector.broadcast %120 : f32 to vector<8x128xf32>
    %622 = arith.mulf %621, %287 : vector<8x128xf32>
    %623 = arith.addf %620, %622 : vector<8x128xf32>
    %624 = vector.broadcast %121 : f32 to vector<8x128xf32>
    %625 = arith.mulf %624, %298 : vector<8x128xf32>
    %626 = arith.addf %623, %625 : vector<8x128xf32>
    %627 = vector.broadcast %122 : f32 to vector<8x128xf32>
    %628 = arith.mulf %627, %309 : vector<8x128xf32>
    %629 = arith.addf %626, %628 : vector<8x128xf32>
    %630 = vector.broadcast %123 : f32 to vector<8x128xf32>
    %631 = arith.mulf %630, %320 : vector<8x128xf32>
    %632 = arith.addf %629, %631 : vector<8x128xf32>
    %633 = vector.broadcast %124 : f32 to vector<8x128xf32>
    %634 = arith.mulf %633, %331 : vector<8x128xf32>
    %635 = arith.addf %632, %634 : vector<8x128xf32>
    %636 = vector.broadcast %125 : f32 to vector<8x128xf32>
    %637 = arith.mulf %636, %342 : vector<8x128xf32>
    %638 = arith.addf %635, %637 : vector<8x128xf32>
    %c11_109 = arith.constant 11 : index
    %639 = arith.index_cast %179 : i32 to index
    %c0_110 = arith.constant 0 : index
    %640 = vector.load %arg6[%c11_109, %639, %c0_110] : memref<12x8x128xf32, #tpu.memory_space<vmem>>, vector<1x8x128xf32>
    %641 = vector.shape_cast %640 : vector<1x8x128xf32> to vector<8x128xf32>
    %642 = vector.shape_cast %638 : vector<8x128xf32> to vector<1x8x128xf32>
    tpu.vector_store %arg6[%c11_109, %639, %c0_110], %642 {strides = array<i32>} : memref<12x8x128xf32, #tpu.memory_space<vmem>>, vector<1x8x128xf32>,
    %c1_i32 = arith.constant 1 : i32
    return
  }
  func.func @transform_0(%arg0: i32) -> i32 {
    %c0_i32 = arith.constant 0 : i32
    %c0_i32_0 = arith.constant 0 : i32
    return %c0_i32 : i32
  }
  func.func @transform_1(%arg0: i32) -> i32 {
    %c0_i32 = arith.constant 0 : i32
    %c0_i32_0 = arith.constant 0 : i32
    return %c0_i32 : i32
  }
  func.func @transform_2(%arg0: i32) -> i32 {
    %c0_i32 = arith.constant 0 : i32
    %c0_i32_0 = arith.constant 0 : i32
    return %c0_i32 : i32
  }
  func.func @transform_3(%arg0: i32) -> i32 {
    %c0_i32 = arith.constant 0 : i32
    %c0_i32_0 = arith.constant 0 : i32
    return %c0_i32 : i32
  }
  func.func @transform_4(%arg0: i32) -> (i32, i32, i32) {
    %c0_i32 = arith.constant 0 : i32
    %c0_i32_0 = arith.constant 0 : i32
    %c0_i32_1 = arith.constant 0 : i32
    return %c0_i32, %arg0, %c0_i32_0 : i32, i32, i32
  }
  func.func @transform_5(%arg0: i32) -> (i32, i32, i32) {
    %c0_i32 = arith.constant 0 : i32
    %c0_i32_0 = arith.constant 0 : i32
    %c0_i32_1 = arith.constant 0 : i32
    return %c0_i32, %arg0, %c0_i32_0 : i32, i32, i32
  }
}

</mosaic_0001>

<bundles_post_ra>
// kernel: mmann_forward.1
= control target key start
LH: loop header
LB: loop body
LE: loop exit
PB: predicated region body
PF: predicated region fallthrough
CT: control target
= control target key end

     0   :  { %s2212_s0 = inlined_call_operand.vmem [shape: f32[42], index: 0, kind: input, shape index: {}]   ;;  %s2213_s1 = inlined_call_operand.vmem [shape: f32[14], index: 1, kind: input, shape index: {}]   ;;  %s2214_s2 = inlined_call_operand.vmem [shape: f32[84], index: 2, kind: input, shape index: {}]   ;;  %s2215_s3 = inlined_call_operand.vmem [shape: f32[12], index: 3, kind: input, shape index: {}]   ;;  %s2216_s4 = inlined_call_operand.vmem [shape: f32[3,16,128], index: 4, kind: input, shape index: {}]   ;;  %s2217_s5 = inlined_call_operand.vmem [shape: f32[12,16,128], index: 5, kind: output, shape index: {}]  }
   0x1   :  { %2222 = sst [smem:[#allocation17_spill]] %s2212_s0 }
   0x2   :  { %2223 = sst [smem:[#allocation18_spill]] %s2213_s1 }
   0x3   :  { %2224 = sst [smem:[#allocation19_spill]] %s2214_s2 }
   0x4   :  { %2225 = sst [smem:[#allocation20_spill]] %s2215_s3 }
   0x5   :  { %2226 = sst [smem:[#allocation21_spill]] %s2216_s4 }
   0x6   :  { %10 = vsyncpa [#allocation3], 0 }
   0x7   :  { %11 = vsyncpa [#allocation5], 0 }
   0x8   :  { %12 = vsyncpa [#allocation8], 0  ;;  %s1495_s18 = smov 0   ;;  %s1497_s19 = smov 0  }
   0x9   :  { %s1499_s20 = smov 0  }
   0xa LB: > { %2227 = sst [smem:[#allocation14_spill]] %s1455_s19  ;;  %s1511_s21 = sadd.s32 4294967295, %s1459_s20   ;;  %s1459_s20 = sphi %s1499_s20, %s2239_s20   ;;  %s1455_s19 = sphi %s1497_s19, %s2241_s19   ;;  %s1451_s18 = sphi %s1495_s18, %s2240_s18  }
   0xb   : > { %s1514_s22 = sadd.s32 1, %s1459_s20   ;;  %s109_s24 = sadd.s32 1, %s1455_s19 }
   0xc   : > { %2228 = sst [smem:[#allocation15_spill]] %s1514_s22  ;;  %s106_s23 = ssub.s32 %s1459_s20, %s1514_s22 }
   0xd   : > { %p107_p0 = scmp.eq.s32.totalorder %s106_s23, 0  ;;  %p116_p1 = scmp.ne.s32.totalorder %s1455_s19, %s1451_s18 }
   0xe   : > { %p117_p2 = scmp.eq.s32.totalorder %s1459_s20, 0  ;;  %p146_p3 = scmp.eq.s32.totalorder %s1511_s21, 1 }
   0xf   : > { %s1524_s25 = scalar_select %p107_p0, %s1455_s19, %s109_s24  }
  0x10   : > { %p1526_p4 = por %p117_p2, %p116_p1  ;;  %p1530_p5 = por %p146_p3, %p116_p1 }
  0x11   : > { %2229 = sst [smem:[#allocation16_spill]] %s1524_s25  ;;  %p1121_p6 = scmp.ge.s32.totalorder %s1459_s20, 1 }
  0x12   : > { %p159_p7 = scmp.lt.s32.totalorder %s1459_s20, 3  ;;  %p1329_p8 = scmp.eq.s32.totalorder %s1511_s21, 0 }
  0x13   : > { %s2233_s1 = sld [smem:[#allocation18_spill]]  ;;  %s1461_s16 = smov [#allocation4]  }
  0x14   : > { %p1537_p9 = pnand %p1121_p6, %p159_p7  ;;  %s2234_s0 = sld [smem:[#allocation17_spill]] }
  0x15   : > { %s2235_s2 = sld [smem:[#allocation19_spill]]  ;;  %s1462_s17 = smov [#allocation2]  }
  0x16   : > { %p1316_p10 = pneg %p1537_p9  ;;  %s2236_s3 = sld [smem:[#allocation20_spill]] }
  0x17   : > { %s1463_s23 = smov [#allocation6]   ;;  %s1464_s24 = smov [#allocation7]  }
  0x18   : > { %p1317_p11 = pnand %p1329_p8, %p1316_p10  ;;  %p1126_p12 = scmp.ge.s32.totalorder %s1459_s20, 2 }
  0x19   : > { %s181_s6 = sshll.u32 %s2233_s1, 4  ;;  %s182_s6 = int_to_ptr.vmem [resolvable:$true] %s181_s6 }
  0x1a   : > { %s171_s9 = sshll.u32 %s2234_s0, 4  ;;  %s172_s9 = int_to_ptr.vmem [resolvable:$true] %s171_s9 }
  0x1b   : > { %s191_s12 = sshll.u32 %s2235_s2, 4  ;;  %s192_s12 = int_to_ptr.vmem [resolvable:$true] %s191_s12 }
  0x1c   : > { %s201_s15 = sshll.u32 %s2236_s3, 4  ;;  %208 = sbr.rel (%p1126_p12) target bundleno = 46 (0x2e), region = 32  ;;  %s202_s15 = int_to_ptr.vmem [resolvable:$true] %s201_s15 }
  0x1d   : > { %1322 = dma.vmem_to_smem (!%p1317_p11), %s182_s6, 16, %s1461_s16, [#allocation5]  }
  0x1e   : > { %1319 = dma.vmem_to_smem (!%p1317_p11), %s172_s9, 16, %s1462_s17, [#allocation3]  }
  0x1f   : > { %1325 = dma.vmem_to_smem (!%p1317_p11), %s192_s12, 16, %s1463_s23, [#allocation5]  }
  0x20   : > { %1328 = dma.vmem_to_smem (!%p1317_p11), %s202_s15, 16, %s1464_s24, [#allocation8]  }
  0x21   : > { %211 = sbr.rel (!%p1526_p4) target bundleno = 46 (0x2e), region = 36  ;;  %s213_s29 = sand.u32 (%p1526_p4), 1, %s1455_s19  }
  0x22   : > { %s1127_s30 = sshll.u32 (%p1526_p4), %s1459_s20, 3  ;;  %s1297_s7 = smul.u32 (%p1526_p4), 24, %s213_s29 }
  0x23   : > { %s2237_s4 = sld [smem:[#allocation21_spill]] (%p1526_p4) }
  0x24   : > { %s215_s10 = scalar_lea.vmem (%p1526_p4), [#allocation9], %s1297_s7 }
  0x29   : > { %s217_s9 = scalar_lea.vmem %s2237_s4, %s1127_s30 }
  0x2a   : > { %v250_v0 = vld [vmem:[%s217_s9] sm:$0xff]  ;;  %v252_v1 = vld [vmem:[%s217_s9 + $0x10] sm:$0xff] }
  0x2b   : > { %v254_v2 = vld [vmem:[%s217_s9 + $0x20] sm:$0xff]  ;;  %251 = vst [vmem:[%s215_s10] sm:$0xff] %v250_v0 }
  0x2c   : > { %253 = vst [vmem:[%s215_s10 + $0x8] sm:$0xff] %v252_v1 }
  0x2d   : > { %255 = vst [vmem:[%s215_s10 + $0x10] sm:$0xff] %v254_v2 }
  0x2e PF: > { %264 = sbr.rel (%p1537_p9) target bundleno = 240 (0xf0), region = 74 }
  0x33   : > { %1438 = dma.done.wait (%p1329_p8), [#allocation3], 16  }
  0x34   : > { %1440 = vsyncadd (%p1329_p8), [#allocation3], 4294967280 }
  0x35   : > { %1442 = dma.done.wait (%p1329_p8), [#allocation5], 32  }
  0x36   : > { %1444 = vsyncadd (%p1329_p8), [#allocation5], 4294967264 }
  0x37   : > { %1446 = dma.done.wait (%p1329_p8), [#allocation8], 16  }
  0x38   : > { %1448 = vsyncadd (%p1329_p8), [#allocation8], 4294967280  ;;  %s2218_s20 = sand.u32 1, %s1451_s18  }
  0x39   : > { %s1298_s26 = smul.u32 24, %s2218_s20 }
  0x3b   : > { %s289_s28 = scalar_lea.vmem [#allocation9], %s1298_s26 }
  0x3c   : > { %293 = sfence }
  0x3d   : > { %s1582_s11 = sld [smem:[#allocation2]]  ;;  %v1628_v3 = vld [vmem:[%s289_s28] sm:$0xff]  ;;  %v1630_v4 = vld [vmem:[%s289_s28 + $0x8] sm:$0xff]  ;;  %v1632_v5 = vld [vmem:[%s289_s28 + $0x10] sm:$0xff] }
  0x3e   : > { %s1584_s12 = sld [smem:[#allocation2 + $0x1]] }
  0x3f   : > { %s1586_s13 = sld [smem:[#allocation2 + $0x2]] }
  0x40   : > { %s1588_s14 = sld [smem:[#allocation2 + $0x3]] }
  0x41   : > { %s1590_s15 = sld [smem:[#allocation2 + $0x4]] }
  0x42   : > { %s1592_s16 = sld [smem:[#allocation2 + $0x5]] }
  0x43   : > { %s1594_s17 = sld [smem:[#allocation2 + $0x6]]  ;;  %v499_v6 = vstv %s1582_s11 }
  0x44   : > { %s1596_s23 = sld [smem:[#allocation2 + $0x7]]  ;;  %v502_v7 = vstv %s1584_s12  ;;  %v500_v15 = vmul.f32 %v499_v6, %v1628_v3 }
  0x45   : > { %s1598_s24 = sld [smem:[#allocation2 + $0x8]]  ;;  %v505_v8 = vstv %s1586_s13  ;;  %v503_v16 = vmul.f32 %v1630_v4, %v502_v7 }
  0x46   : > { %s1600_s29 = sld [smem:[#allocation2 + $0x9]]  ;;  %v509_v9 = vstv %s1588_s14  ;;  %v506_v17 = vmul.f32 %v1632_v5, %v505_v8 }
  0x47   : > { %s1602_s30 = sld [smem:[#allocation2 + $0xa]]  ;;  %v512_v10 = vstv %s1590_s15  ;;  %v510_v18 = vmul.f32 %v509_v9, %v1628_v3 }
  0x48   : > { %s1604_s7 = sld [smem:[#allocation2 + $0xb]]  ;;  %v515_v11 = vstv %s1592_s16  ;;  %v513_v19 = vmul.f32 %v1630_v4, %v512_v10 }
  0x49   : > { %s1606_s8 = sld [smem:[#allocation2 + $0xc]]  ;;  %v519_v12 = vstv %s1594_s17  ;;  %v516_v20 = vmul.f32 %v1632_v5, %v515_v11 }
  0x4a   : > { %s1608_s6 = sld [smem:[#allocation2 + $0xd]]  ;;  %v522_v13 = vstv %s1596_s23  ;;  %v520_v21 = vmul.f32 %v519_v12, %v1628_v3 }
  0x4b   : > { %s1610_s9 = sld [smem:[#allocation2 + $0xe]]  ;;  %v525_v14 = vstv %s1598_s24  ;;  %v523_v23 = vmul.f32 %v1630_v4, %v522_v13 }
  0x4c   : > { %s1612_s10 = sld [smem:[#allocation2 + $0xf]]  ;;  %v529_v22 = vstv %s1600_s29  ;;  %v526_v24 = vmul.f32 %v1632_v5, %v525_v14 }
  0x4d   : > { %s1614_s26 = sld [smem:[#allocation2 + $0x10]]  ;;  %v532_v25 = vstv %s1602_s30  ;;  %v530_v31 = vmul.f32 %v529_v22, %v1628_v3 }
  0x4e   : > { %s1616_s20 = sld [smem:[#allocation2 + $0x11]]  ;;  %v535_v26 = vstv %s1604_s7  ;;  %v533_v35 = vmul.f32 %v1630_v4, %v532_v25 }
  0x4f   : > { %s1618_s0 = sld [smem:[#allocation2 + $0x12]]  ;;  %v539_v27 = vstv %s1606_s8  ;;  %v536_v36 = vmul.f32 %v1632_v5, %v535_v26 }
  0x50   : > { %s1620_s1 = sld [smem:[#allocation2 + $0x13]]  ;;  %v542_v28 = vstv %s1608_s6  ;;  %v540_v39 = vmul.f32 %v539_v27, %v1628_v3 }
  0x51   : > { %s1622_s2 = sld [smem:[#allocation2 + $0x14]]  ;;  %v545_v29 = vstv %s1610_s9  ;;  %v543_v40 = vmul.f32 %v1630_v4, %v542_v28 }
  0x52   : > { %s1624_s3 = sld [smem:[#allocation6]]  ;;  %v549_v30 = vstv %s1612_s10  ;;  %v546_v41 = vmul.f32 %v1632_v5, %v545_v29  ;;  %s2238_s10 = sand.u32 1, %s1451_s18  }
  0x53   : > { %s1626_s4 = sld [smem:[#allocation6 + $0x1]]  ;;  %v552_v32 = vstv %s1614_s26  ;;  %v550_v42 = vmul.f32 %v549_v30, %v1628_v3  ;;  %s1299_s26 = smul.u32 96, %s2238_s10 }
  0x54   : > { %s1634_s25 = sld [smem:[#allocation6 + $0x2]]  ;;  %v555_v33 = vstv %s1616_s20  ;;  %v553_v44 = vmul.f32 %v1630_v4, %v552_v32 }
  0x55   : > { %s1640_s19 = sld [smem:[#allocation6 + $0x3]]  ;;  %v559_v34 = vstv %s1618_s0  ;;  %v556_v45 = vmul.f32 %v1632_v5, %v555_v33 }
  0x56   : > { %s1645_s22 = sld [smem:[#allocation6 + $0x4]]  ;;  %v562_v37 = vstv %s1620_s1  ;;  %v560_v46 = vmul.f32 %v559_v34, %v1628_v3 }
  0x57   : > { %s1649_s28 = sld [smem:[#allocation6 + $0x5]]  ;;  %v565_v38 = vstv %s1622_s2  ;;  %v563_v49 = vmul.f32 %v1630_v4, %v562_v37 }
  0x58   : > { %s1655_s11 = sld [smem:[#allocation4]]  ;;  %v566_v50 = vmul.f32 %v1632_v5, %v565_v38  ;;  %v639_v53 = vstv %s1624_s3 }
  0x59   : > { %s1661_s12 = sld [smem:[#allocation4 + $0x1]]  ;;  %v642_v54 = vstv %s1626_s4 }
  0x5a   : > { %s1667_s13 = sld [smem:[#allocation4 + $0x2]]  ;;  %v645_v58 = vstv %s1634_s25 }
  0x5b   : > { %s1673_s14 = sld [smem:[#allocation4 + $0x3]]  ;;  %v648_v62 = vstv %s1640_s19 }
  0x5c   : > { %s1679_s15 = sld [smem:[#allocation4 + $0x4]]  ;;  %v651_v29 = vstv %s1645_s22 }
  0x5d   : > { %s1685_s16 = sld [smem:[#allocation4 + $0x5]]  ;;  %v654_v38 = vstv %s1649_s28 }
  0x5e   : > { %v441_v43 = vstv %s1655_s11  ;;  %s1692_s0 = sld [smem:[#allocation4 + $0x6]] }
  0x5f   : > { %v443_v47 = vstv %s1661_s12  ;;  %s1698_s1 = sld [smem:[#allocation7]]  ;;  %v501_v48 = vadd.f32 %v500_v15, %v441_v43 }
  0x60   : > { %v445_v51 = vstv %s1667_s13  ;;  %v511_v52 = vadd.f32 %v510_v18, %v443_v47  ;;  %s1705_s2 = sld [smem:[#allocation6 + $0x7]] }
  0x61   : > { %s1707_s20 = sld [smem:[#allocation6 + $0x6]]  ;;  %v447_v55 = vstv %s1673_s14  ;;  %v504_v56 = vadd.f32 %v503_v16, %v501_v48  ;;  %v521_v57 = vadd.f32 %v520_v21, %v445_v51 }
  0x62   : > { %v449_v59 = vstv %s1679_s15  ;;  %v514_v60 = vadd.f32 %v513_v19, %v511_v52  ;;  %v531_v61 = vadd.f32 %v530_v31, %v447_v55  ;;  %s1713_s17 = sld [smem:[#allocation6 + $0x8]] }
  0x63   : > { %v451_v63 = vstv %s1685_s16  ;;  %v507_v0 = vadd.f32 %v506_v17, %v504_v56  ;;  %v524_v1 = vadd.f32 %v523_v23, %v521_v57  ;;  %v541_v2 = vadd.f32 %v540_v39, %v449_v59  ;;  %s1716_s3 = sld [smem:[#allocation6 + $0x9]]  ;;  %s1804_s16 = scalar_lea.vmem [#allocation10], %s1299_s26 }
  0x64   : > { %v453_v6 = vstv %s1692_s0  ;;  %v517_v7 = vadd.f32 %v516_v20, %v514_v60  ;;  %v534_v8 = vadd.f32 %v533_v35, %v531_v61  ;;  %v551_v9 = vadd.f32 %v550_v42, %v451_v63  ;;  %s1719_s4 = sld [smem:[#allocation6 + $0xa]] }
  0x65   : > { %v469_v10 = vstv %s1698_s1  ;;  %v1722_v11 = vmax.f32 %v507_v0, 0.0  ;;  %v527_v12 = vadd.f32 %v526_v24, %v524_v1  ;;  %v544_v13 = vadd.f32 %v543_v40, %v541_v2  ;;  %s1724_s19 = sld [smem:[#allocation6 + $0xb]] }
  0x66   : > { %v1726_v14 = vmax.f32 %v517_v7, 0.0  ;;  %v537_v15 = vadd.f32 %v536_v36, %v534_v8  ;;  %v554_v16 = vadd.f32 %v553_v44, %v551_v9  ;;  %v561_v17 = vadd.f32 %v560_v46, %v453_v6  ;;  %s1728_s25 = sld [smem:[#allocation6 + $0xc]] }
  0x67   : > { %v1730_v18 = vmax.f32 %v527_v12, 0.0  ;;  %v547_v19 = vadd.f32 %v546_v41, %v544_v13  ;;  %v640_v20 = vmul.f32 %v639_v53, %v1722_v11  ;;  %s1733_s23 = sld [smem:[#allocation7 + $0x1]]  ;;  %v661_v21 = vstv %s1705_s2 }
  0x68   : > { %v1736_v22 = vmax.f32 %v537_v15, 0.0  ;;  %v557_v23 = vadd.f32 %v556_v45, %v554_v16  ;;  %v564_v24 = vadd.f32 %v563_v49, %v561_v17  ;;  %v643_v25 = vmul.f32 %v642_v54, %v1726_v14  ;;  %s1739_s24 = sld [smem:[#allocation6 + $0xe]] }
  0x69   : > { %v1741_v26 = vmax.f32 %v547_v19, 0.0  ;;  %v641_v27 = vadd.f32 %v640_v20, %v469_v10  ;;  %v646_v28 = vmul.f32 %v645_v58, %v1730_v18  ;;  %s1745_s29 = sld [smem:[#allocation6 + $0xf]]  ;;  %v662_v31 = vmul.f32 %v661_v21, %v1722_v11 }
  0x6a   : > { %v567_v30 = vadd.f32 %v566_v50, %v564_v24  ;;  %s1747_s30 = sld [smem:[#allocation6 + $0xd]]  ;;  %v664_v32 = vstv %s1713_s17  ;;  %v1751_v33 = vmax.f32 %v557_v23, 0.0  ;;  %v649_v35 = vmul.f32 %v648_v62, %v1736_v22 }
  0x6b   : > { %v644_v34 = vadd.f32 %v643_v25, %v641_v27  ;;  %v667_v36 = vstv %s1716_s3  ;;  %s1755_s7 = sld [smem:[#allocation6 + $0x10]]  ;;  %v652_v37 = vmul.f32 %v651_v29, %v1741_v26  ;;  %v665_v39 = vmul.f32 %v664_v32, %v1726_v14 }
  0x6c   : > { %s1760_s22 = sld [smem:[#allocation6 + $0x11]]  ;;  %v1762_v40 = vmax.f32 %v567_v30, 0.0  ;;  %v670_v43 = vstv %s1719_s4  ;;  %v657_v44 = vstv %s1707_s20  ;;  %v668_v46 = vmul.f32 %v667_v36, %v1730_v18 }
  0x6d   : > { %v647_v41 = vadd.f32 %v646_v28, %v644_v34  ;;  %v471_v42 = vstv %s1733_s23  ;;  %s1766_s8 = sld [smem:[#allocation6 + $0x12]]  ;;  %v655_v48 = vmul.f32 %v654_v38, %v1751_v33  ;;  %v673_v49 = vstv %s1724_s19 }
  0x6e   : > { %v663_v45 = vadd.f32 %v662_v31, %v471_v42  ;;  %s1770_s6 = sld [smem:[#allocation6 + $0x13]]  ;;  %v684_v50 = vstv %s1739_s24  ;;  %v671_v52 = vmul.f32 %v670_v43, %v1736_v22  ;;  %v658_v54 = vmul.f32 %v657_v44, %v1762_v40 }
  0x6f   : > { %v650_v47 = vadd.f32 %v649_v35, %v647_v41  ;;  %s1271_s9 = sld [smem:[#allocation7 + $0x2]]  ;;  %v676_v55 = vstv %s1728_s25  ;;  %v687_v56 = vstv %s1745_s29  ;;  %v674_v58 = vmul.f32 %v673_v49, %v1741_v26 }
  0x70   : > { %v666_v51 = vadd.f32 %v665_v39, %v663_v45  ;;  %s1778_s28 = sld [smem:[#allocation6 + $0x15]]  ;;  %v685_v59 = vmul.f32 %v684_v50, %v1722_v11  ;;  %v679_v61 = vstv %s1747_s30  ;;  %v677_v0 = vmul.f32 %v676_v55, %v1751_v33 }
  0x71   : > { %v653_v53 = vadd.f32 %v652_v37, %v650_v47  ;;  %s1783_s11 = sld [smem:[#allocation6 + $0x16]]  ;;  %v690_v62 = vstv %s1755_s7  ;;  %v688_v1 = vmul.f32 %v687_v56, %v1726_v14  ;;  %v680_v9 = vmul.f32 %v679_v61, %v1762_v40 }
  0x72   : > { %v669_v57 = vadd.f32 %v668_v46, %v666_v51  ;;  %s1786_s12 = sld [smem:[#allocation6 + $0x14]]  ;;  %v693_v7 = vstv %s1760_s22  ;;  %v691_v12 = vmul.f32 %v690_v62, %v1730_v18 }
  0x73   : > { %v656_v60 = vadd.f32 %v655_v48, %v653_v53  ;;  %s1791_s18 = sld [smem:[#allocation6 + $0x17]]  ;;  %v696_v13 = vstv %s1766_s8  ;;  %v694_v19 = vmul.f32 %v693_v7, %v1736_v22 }
  0x74   : > { %v672_v63 = vadd.f32 %v671_v52, %v669_v57  ;;  %s1795_s13 = sld [smem:[#allocation6 + $0x18]]  ;;  %v699_v20 = vstv %s1770_s6  ;;  %v697_v25 = vmul.f32 %v696_v13, %v1741_v26 }
  0x75   : > { %v659_v2 = vadd.f32 %v658_v54, %v656_v60  ;;  %v473_v6 = vstv %s1271_s9  ;;  %s1798_s14 = sld [smem:[#allocation6 + $0x19]]  ;;  %v700_v31 = vmul.f32 %v699_v20, %v1751_v33 }
  0x76   : > { %v675_v8 = vadd.f32 %v674_v58, %v672_v63  ;;  %v686_v10 = vadd.f32 %v685_v59, %v473_v6  ;;  %s1802_s15 = sld [smem:[#allocation6 + $0x1a]]  ;;  %v707_v15 = vstv %s1778_s28 }
  0x77   : > { %660 = vst [vmem:[%s1804_s16] sm:$0xff] %v659_v2  ;;  %s1272_s0 = sld [smem:[#allocation7 + $0x3]]  ;;  %v710_v21 = vstv %s1783_s11  ;;  %v708_v27 = vmul.f32 %v707_v15, %v1722_v11 }
  0x78   : > { %v678_v16 = vadd.f32 %v677_v0, %v675_v8  ;;  %v689_v17 = vadd.f32 %v688_v1, %v686_v10  ;;  %s1810_s1 = sld [smem:[#allocation6 + $0x1c]]  ;;  %v702_v28 = vstv %s1786_s12  ;;  %v711_v32 = vmul.f32 %v710_v21, %v1726_v14 }
  0x79   : > { %s1814_s2 = sld [smem:[#allocation6 + $0x1d]]  ;;  %v713_v29 = vstv %s1791_s18  ;;  %v703_v37 = vmul.f32 %v702_v28, %v1762_v40 }
  0x7a   : > { %v681_v23 = vadd.f32 %v680_v9, %v678_v16  ;;  %v692_v24 = vadd.f32 %v691_v12, %v689_v17  ;;  %s1817_s20 = sld [smem:[#allocation6 + $0x1b]]  ;;  %v716_v35 = vstv %s1795_s13  ;;  %v714_v39 = vmul.f32 %v713_v29, %v1730_v18 }
  0x7b   : > { %s1822_s17 = sld [smem:[#allocation6 + $0x1e]]  ;;  %v719_v41 = vstv %s1798_s14  ;;  %v717_v45 = vmul.f32 %v716_v35, %v1736_v22 }
  0x7c   : > { %1283 = vst [vmem:[%s1804_s16 + $0x8] sm:$0xff] %v681_v23  ;;  %v695_v30 = vadd.f32 %v694_v19, %v692_v24  ;;  %s1827_s3 = sld [smem:[#allocation6 + $0x1f]]  ;;  %v722_v46 = vstv %s1802_s15  ;;  %v720_v50 = vmul.f32 %v719_v41, %v1741_v26 }
  0x7d   : > { %v475_v34 = vstv %s1272_s0  ;;  %s1830_s4 = sld [smem:[#allocation6 + $0x20]]  ;;  %v723_v55 = vmul.f32 %v722_v46, %v1751_v33 }
  0x7e   : > { %v698_v36 = vadd.f32 %v697_v25, %v695_v30  ;;  %v709_v38 = vadd.f32 %v708_v27, %v475_v34  ;;  %s1834_s19 = sld [smem:[#allocation6 + $0x21]]  ;;  %v731_v42 = vstv %s1810_s1 }
  0x7f   : > { %s1273_s25 = sld [smem:[#allocation7 + $0x4]]  ;;  %v734_v47 = vstv %s1814_s2  ;;  %v732_v51 = vmul.f32 %v731_v42, %v1722_v11 }
  0x80   : > { %v701_v43 = vadd.f32 %v700_v31, %v698_v36  ;;  %v712_v44 = vadd.f32 %v711_v32, %v709_v38  ;;  %s1839_s23 = sld [smem:[#allocation6 + $0x23]]  ;;  %v725_v52 = vstv %s1817_s20  ;;  %v735_v56 = vmul.f32 %v734_v47, %v1726_v14 }
  0x81   : > { %s1843_s24 = sld [smem:[#allocation6 + $0x24]]  ;;  %v737_v53 = vstv %s1822_s17  ;;  %v726_v60 = vmul.f32 %v725_v52, %v1762_v40 }
  0x82   : > { %v704_v48 = vadd.f32 %v703_v37, %v701_v43  ;;  %v715_v49 = vadd.f32 %v714_v39, %v712_v44  ;;  %s1846_s29 = sld [smem:[#allocation6 + $0x22]]  ;;  %v740_v58 = vstv %s1827_s3  ;;  %v738_v62 = vmul.f32 %v737_v53, %v1730_v18 }
  0x83   : > { %s1851_s30 = sld [smem:[#allocation6 + $0x25]]  ;;  %v743_v63 = vstv %s1830_s4  ;;  %v741_v6 = vmul.f32 %v740_v58, %v1736_v22 }
  0x84   : > { %1284 = vst [vmem:[%s1804_s16 + $0x10] sm:$0xff] %v704_v48  ;;  %v718_v54 = vadd.f32 %v717_v45, %v715_v49  ;;  %s1856_s7 = sld [smem:[#allocation6 + $0x26]]  ;;  %v746_v7 = vstv %s1834_s19  ;;  %v744_v12 = vmul.f32 %v743_v63, %v1741_v26 }
  0x85   : > { %v477_v57 = vstv %s1273_s25  ;;  %s1859_s22 = sld [smem:[#allocation6 + $0x27]]  ;;  %v747_v19 = vmul.f32 %v746_v7, %v1751_v33 }
  0x86   : > { %v721_v59 = vadd.f32 %v720_v50, %v718_v54  ;;  %v733_v61 = vadd.f32 %v732_v51, %v477_v57  ;;  %s1863_s8 = sld [smem:[#allocation6 + $0x28]]  ;;  %v755_v0 = vstv %s1839_s23 }
  0x87   : > { %s1274_s6 = sld [smem:[#allocation7 + $0x5]]  ;;  %v758_v8 = vstv %s1843_s24  ;;  %v756_v13 = vmul.f32 %v755_v0, %v1722_v11 }
  0x88   : > { %v724_v1 = vadd.f32 %v723_v55, %v721_v59  ;;  %v736_v2 = vadd.f32 %v735_v56, %v733_v61  ;;  %s1868_s9 = sld [smem:[#allocation6 + $0x29]]  ;;  %v749_v15 = vstv %s1846_s29  ;;  %v759_v20 = vmul.f32 %v758_v8, %v1726_v14 }
  0x89   : > { %s1872_s10 = sld [smem:[#allocation2 + $0x15]]  ;;  %v761_v16 = vstv %s1851_s30  ;;  %v750_v24 = vmul.f32 %v749_v15, %v1762_v40 }
  0x8a   : > { %v727_v9 = vadd.f32 %v726_v60, %v724_v1  ;;  %v739_v10 = vadd.f32 %v738_v62, %v736_v2  ;;  %s1876_s26 = sld [smem:[#allocation2 + $0x16]]  ;;  %v764_v23 = vstv %s1856_s7  ;;  %v762_v27 = vmul.f32 %v761_v16, %v1730_v18 }
  0x8b   : > { %s1880_s28 = sld [smem:[#allocation2 + $0x17]]  ;;  %v767_v28 = vstv %s1859_s22  ;;  %v765_v30 = vmul.f32 %v764_v23, %v1736_v22 }
  0x8c   : > { %1285 = vst [vmem:[%s1804_s16 + $0x18] sm:$0xff] %v727_v9  ;;  %v742_v17 = vadd.f32 %v741_v6, %v739_v10  ;;  %s1885_s11 = sld [smem:[#allocation2 + $0x18]]  ;;  %v770_v31 = vstv %s1863_s8  ;;  %v768_v35 = vmul.f32 %v767_v28, %v1741_v26 }
  0x8d   : > { %v479_v21 = vstv %s1274_s6  ;;  %s1888_s12 = sld [smem:[#allocation2 + $0x19]]  ;;  %v771_v37 = vmul.f32 %v770_v31, %v1751_v33 }
  0x8e   : > { %v745_v11 = vadd.f32 %v744_v12, %v742_v17  ;;  %v757_v25 = vadd.f32 %v756_v13, %v479_v21  ;;  %s1892_s18 = sld [smem:[#allocation2 + $0x1a]]  ;;  %v773_v18 = vstv %s1868_s9 }
  0x8f   : > { %s1895_s13 = sld [smem:[#allocation2 + $0x1b]]  ;;  %v774_v38 = vmul.f32 %v773_v18, %v1762_v40  ;;  %v569_v40 = vstv %s1872_s10 }
  0x90   : > { %v748_v14 = vadd.f32 %v747_v19, %v745_v11  ;;  %v760_v29 = vadd.f32 %v759_v20, %v757_v25  ;;  %s1898_s14 = sld [smem:[#allocation2 + $0x1c]]  ;;  %v572_v39 = vstv %s1876_s26  ;;  %v570_v48 = vmul.f32 %v569_v40, %v1628_v3 }
  0x91   : > { %s1901_s15 = sld [smem:[#allocation2 + $0x1d]]  ;;  %v575_v41 = vstv %s1880_s28  ;;  %v573_v49 = vmul.f32 %v1630_v4, %v572_v39 }
  0x92   : > { %v751_v32 = vadd.f32 %v750_v24, %v748_v14  ;;  %v763_v34 = vadd.f32 %v762_v27, %v760_v29  ;;  %s1904_s0 = sld [smem:[#allocation2 + $0x1e]]  ;;  %v579_v42 = vstv %s1885_s11  ;;  %v576_v50 = vmul.f32 %v1632_v5, %v575_v41 }
  0x93   : > { %s1907_s1 = sld [smem:[#allocation2 + $0x1f]]  ;;  %v582_v43 = vstv %s1888_s12  ;;  %v580_v51 = vmul.f32 %v579_v42, %v1628_v3 }
  0x94   : > { %1286 = vst [vmem:[%s1804_s16 + $0x20] sm:$0xff] %v751_v32  ;;  %v766_v36 = vadd.f32 %v765_v30, %v763_v34  ;;  %s1911_s2 = sld [smem:[#allocation2 + $0x20]]  ;;  %v585_v44 = vstv %s1892_s18  ;;  %v583_v52 = vmul.f32 %v1630_v4, %v582_v43 }
  0x95   : > { %s1913_s20 = sld [smem:[#allocation2 + $0x21]]  ;;  %v589_v45 = vstv %s1895_s13  ;;  %v586_v53 = vmul.f32 %v1632_v5, %v585_v44 }
  0x96   : > { %v769_v22 = vadd.f32 %v768_v35, %v766_v36  ;;  %s1916_s17 = sld [smem:[#allocation2 + $0x22]]  ;;  %v592_v46 = vstv %s1898_s14  ;;  %v590_v54 = vmul.f32 %v589_v45, %v1628_v3 }
  0x97   : > { %s1918_s3 = sld [smem:[#allocation2 + $0x23]]  ;;  %v595_v47 = vstv %s1901_s15  ;;  %v593_v56 = vmul.f32 %v1630_v4, %v592_v46 }
  0x98   : > { %v772_v26 = vadd.f32 %v771_v37, %v769_v22  ;;  %s1920_s4 = sld [smem:[#allocation2 + $0x24]]  ;;  %v599_v55 = vstv %s1904_s0  ;;  %v596_v57 = vmul.f32 %v1632_v5, %v595_v47 }
  0x99   : > { %s1922_s19 = sld [smem:[#allocation2 + $0x25]]  ;;  %v602_v58 = vstv %s1907_s1  ;;  %v600_v0 = vmul.f32 %v599_v55, %v1628_v3 }
  0x9a   : > { %v775_v33 = vadd.f32 %v774_v38, %v772_v26  ;;  %s1924_s25 = sld [smem:[#allocation2 + $0x26]]  ;;  %v605_v59 = vstv %s1911_s2  ;;  %v603_v7 = vmul.f32 %v1630_v4, %v602_v58 }
  0x9b   : > { %s1926_s23 = sld [smem:[#allocation2 + $0x27]]  ;;  %v609_v60 = vstv %s1913_s20  ;;  %v606_v8 = vmul.f32 %v1632_v5, %v605_v59 }
  0x9c   : > { %1287 = vst [vmem:[%s1804_s16 + $0x28] sm:$0xff] %v775_v33  ;;  %s1929_s24 = sld [smem:[#allocation2 + $0x28]]  ;;  %v612_v61 = vstv %s1916_s17  ;;  %v610_v12 = vmul.f32 %v609_v60, %v1628_v3 }
  0x9d   : > { %s1931_s29 = sld [smem:[#allocation2 + $0x29]]  ;;  %v615_v62 = vstv %s1918_s3  ;;  %v613_v13 = vmul.f32 %v1630_v4, %v612_v61 }
  0x9e   : > { %s1933_s30 = sld [smem:[#allocation6 + $0x2a]]  ;;  %v619_v63 = vstv %s1920_s4  ;;  %v616_v15 = vmul.f32 %v1632_v5, %v615_v62 }
  0x9f   : > { %s1935_s7 = sld [smem:[#allocation6 + $0x2b]]  ;;  %v622_v1 = vstv %s1922_s19  ;;  %v620_v16 = vmul.f32 %v619_v63, %v1628_v3 }
  0xa0   : > { %s1937_s22 = sld [smem:[#allocation6 + $0x2c]]  ;;  %v625_v2 = vstv %s1924_s25  ;;  %v623_v19 = vmul.f32 %v1630_v4, %v622_v1 }
  0xa1   : > { %s1943_s8 = sld [smem:[#allocation6 + $0x2d]]  ;;  %v629_v6 = vstv %s1926_s23  ;;  %v626_v20 = vmul.f32 %v1632_v5, %v625_v2 }
  0xa2   : > { %s1948_s6 = sld [smem:[#allocation6 + $0x2e]]  ;;  %v632_v9 = vstv %s1929_s24  ;;  %v630_v21 = vmul.f32 %v629_v6, %v1628_v3 }
  0xa3   : > { %s1952_s9 = sld [smem:[#allocation6 + $0x2f]]  ;;  %v635_v10 = vstv %s1931_s29  ;;  %v633_v24 = vmul.f32 %v1630_v4, %v632_v9 }
  0xa4   : > { %s1958_s10 = sld [smem:[#allocation4 + $0x7]]  ;;  %v636_v25 = vmul.f32 %v1632_v5, %v635_v10  ;;  %v779_v14 = vstv %s1933_s30 }
  0xa5   : > { %s1964_s26 = sld [smem:[#allocation4 + $0x8]]  ;;  %v782_v29 = vstv %s1935_s7 }
  0xa6   : > { %s1970_s28 = sld [smem:[#allocation4 + $0x9]]  ;;  %v785_v32 = vstv %s1937_s22 }
  0xa7   : > { %s1976_s11 = sld [smem:[#allocation4 + $0xa]]  ;;  %v788_v18 = vstv %s1943_s8 }
  0xa8   : > { %s1982_s12 = sld [smem:[#allocation4 + $0xb]]  ;;  %v791_v59 = vstv %s1948_s6 }
  0xa9   : > { %s1988_s18 = sld [smem:[#allocation4 + $0xc]] }
  0xaa   : > { %v455_v17 = vstv %s1958_s10  ;;  %s1995_s13 = sld [smem:[#allocation4 + $0xd]] }
  0xab   : > { %v457_v23 = vstv %s1964_s26  ;;  %s2001_s14 = sld [smem:[#allocation7 + $0x6]]  ;;  %v571_v11 = vadd.f32 %v570_v48, %v455_v17 }
  0xac   : > { %v459_v27 = vstv %s1970_s28  ;;  %v581_v28 = vadd.f32 %v580_v51, %v457_v23  ;;  %s2008_s15 = sld [smem:[#allocation6 + $0x31]] }
  0xad   : > { %s2010_s0 = sld [smem:[#allocation6 + $0x30]]  ;;  %v461_v3 = vstv %s1976_s11  ;;  %v574_v30 = vadd.f32 %v573_v49, %v571_v11  ;;  %v591_v31 = vadd.f32 %v590_v54, %v459_v27 }
  0xae   : > { %v463_v34 = vstv %s1982_s12  ;;  %v584_v35 = vadd.f32 %v583_v52, %v581_v28  ;;  %v601_v4 = vadd.f32 %v600_v0, %v461_v3  ;;  %s2016_s1 = sld [smem:[#allocation6 + $0x32]] }
  0xaf   : > { %v465_v5 = vstv %s1988_s18  ;;  %v577_v36 = vadd.f32 %v576_v50, %v574_v30  ;;  %v594_v37 = vadd.f32 %v593_v56, %v591_v31  ;;  %v611_v22 = vadd.f32 %v610_v12, %v463_v34  ;;  %s2019_s2 = sld [smem:[#allocation6 + $0x33]] }
  0xb0   : > { %v467_v38 = vstv %s1995_s13  ;;  %v587_v26 = vadd.f32 %v586_v53, %v584_v35  ;;  %v604_v33 = vadd.f32 %v603_v7, %v601_v4  ;;  %v621_v40 = vadd.f32 %v620_v16, %v465_v5  ;;  %s2022_s20 = sld [smem:[#allocation6 + $0x34]] }
  0xb1   : > { %v481_v39 = vstv %s2001_s14  ;;  %v2025_v41 = vmax.f32 %v577_v36, 0.0  ;;  %v597_v42 = vadd.f32 %v596_v57, %v594_v37  ;;  %v614_v43 = vadd.f32 %v613_v13, %v611_v22  ;;  %s2027_s17 = sld [smem:[#allocation6 + $0x35]] }
  0xb2   : > { %v2029_v44 = vmax.f32 %v587_v26, 0.0  ;;  %v607_v45 = vadd.f32 %v606_v8, %v604_v33  ;;  %v624_v46 = vadd.f32 %v623_v19, %v621_v40  ;;  %v631_v47 = vadd.f32 %v630_v21, %v467_v38  ;;  %s2031_s3 = sld [smem:[#allocation6 + $0x36]] }
  0xb3   : > { %v2033_v48 = vmax.f32 %v597_v42, 0.0  ;;  %v617_v49 = vadd.f32 %v616_v15, %v614_v43  ;;  %v780_v50 = vmul.f32 %v779_v14, %v2025_v41  ;;  %s2036_s4 = sld [smem:[#allocation7 + $0x7]]  ;;  %v803_v51 = vstv %s2008_s15 }
  0xb4   : > { %v2039_v52 = vmax.f32 %v607_v45, 0.0  ;;  %v627_v53 = vadd.f32 %v626_v20, %v624_v46  ;;  %v634_v54 = vadd.f32 %v633_v24, %v631_v47  ;;  %v783_v55 = vmul.f32 %v782_v29, %v2029_v44  ;;  %s2042_s19 = sld [smem:[#allocation6 + $0x38]] }
  0xb5   : > { %v2044_v56 = vmax.f32 %v617_v49, 0.0  ;;  %v781_v57 = vadd.f32 %v780_v50, %v481_v39  ;;  %v786_v58 = vmul.f32 %v785_v32, %v2033_v48  ;;  %s2048_s25 = sld [smem:[#allocation6 + $0x39]]  ;;  %v804_v61 = vmul.f32 %v803_v51, %v2025_v41 }
  0xb6   : > { %v637_v60 = vadd.f32 %v636_v25, %v634_v54  ;;  %s2050_s23 = sld [smem:[#allocation6 + $0x37]]  ;;  %v806_v62 = vstv %s2016_s1  ;;  %v2054_v63 = vmax.f32 %v627_v53, 0.0  ;;  %v789_v1 = vmul.f32 %v788_v18, %v2039_v52 }
  0xb7   : > { %v784_v0 = vadd.f32 %v783_v55, %v781_v57  ;;  %v809_v2 = vstv %s2019_s2  ;;  %s2058_s24 = sld [smem:[#allocation6 + $0x3a]]  ;;  %v792_v6 = vmul.f32 %v791_v59, %v2044_v56  ;;  %v794_v7 = vstv %s1952_s9 }
  0xb8   : > { %v807_v8 = vmul.f32 %v806_v62, %v2029_v44  ;;  %s2063_s29 = sld [smem:[#allocation6 + $0x3b]]  ;;  %v2065_v9 = vmax.f32 %v637_v60, 0.0  ;;  %v812_v13 = vstv %s2022_s20  ;;  %v797_v15 = vstv %s2010_s0 }
  0xb9   : > { %v787_v10 = vadd.f32 %v786_v58, %v784_v0  ;;  %v483_v12 = vstv %s2036_s4  ;;  %s2069_s30 = sld [smem:[#allocation6 + $0x3c]]  ;;  %v810_v17 = vmul.f32 %v809_v2, %v2033_v48  ;;  %v795_v20 = vmul.f32 %v794_v7, %v2054_v63 }
  0xba   : > { %v805_v16 = vadd.f32 %v804_v61, %v483_v12  ;;  %s2073_s7 = sld [smem:[#allocation6 + $0x3d]]  ;;  %v815_v21 = vstv %s2027_s17  ;;  %v827_v23 = vstv %s2042_s19  ;;  %v813_v24 = vmul.f32 %v812_v13, %v2039_v52 }
  0xbb   : > { %v790_v19 = vadd.f32 %v789_v1, %v787_v10  ;;  %s1277_s22 = sld [smem:[#allocation7 + $0x8]]  ;;  %v798_v27 = vmul.f32 %v797_v15, %v2065_v9  ;;  %v818_v28 = vstv %s2031_s3  ;;  %v830_v14 = vstv %s2048_s25 }
  0xbc   : > { %v808_v11 = vadd.f32 %v807_v8, %v805_v16  ;;  %s2079_s8 = sld [smem:[#allocation6 + $0x3f]]  ;;  %v816_v3 = vmul.f32 %v815_v21, %v2044_v56  ;;  %v828_v30 = vmul.f32 %v827_v23, %v2025_v41  ;;  %v821_v32 = vstv %s2050_s23 }
  0xbd   : > { %v793_v25 = vadd.f32 %v792_v6, %v790_v19  ;;  %s2084_s6 = sld [smem:[#allocation6 + $0x40]]  ;;  %v833_v34 = vstv %s2058_s24  ;;  %v819_v4 = vmul.f32 %v818_v28, %v2054_v63  ;;  %v831_v18 = vmul.f32 %v830_v14, %v2029_v44 }
  0xbe   : > { %v811_v29 = vadd.f32 %v810_v17, %v808_v11  ;;  %s2087_s9 = sld [smem:[#allocation6 + $0x3e]]  ;;  %v836_v37 = vstv %s2063_s29  ;;  %v822_v38 = vmul.f32 %v821_v32, %v2065_v9  ;;  %v834_v33 = vmul.f32 %v833_v34, %v2033_v48 }
  0xbf   : > { %v796_v31 = vadd.f32 %v795_v20, %v793_v25  ;;  %s2092_s10 = sld [smem:[#allocation6 + $0x41]]  ;;  %v839_v40 = vstv %s2069_s30  ;;  %v837_v45 = vmul.f32 %v836_v37, %v2039_v52 }
  0xc0   : > { %v814_v35 = vadd.f32 %v813_v24, %v811_v29  ;;  %s2096_s26 = sld [smem:[#allocation6 + $0x42]]  ;;  %v842_v46 = vstv %s2073_s7  ;;  %v840_v51 = vmul.f32 %v839_v40, %v2044_v56  ;;  %s1294_s7 = sshll.u32 (%p1530_p5), %s1511_s21, 3 }
  0xc1   : > { %v799_v5 = vadd.f32 %v798_v27, %v796_v31  ;;  %v485_v36 = vstv %s1277_s22  ;;  %s2099_s28 = sld [smem:[#allocation6 + $0x43]]  ;;  %v843_v58 = vmul.f32 %v842_v46, %v2054_v63 }
  0xc2   : > { %v817_v22 = vadd.f32 %v816_v3, %v814_v35  ;;  %v829_v26 = vadd.f32 %v828_v30, %v485_v36  ;;  %s2103_s11 = sld [smem:[#allocation6 + $0x44]]  ;;  %v851_v39 = vstv %s2079_s8 }
  0xc3   : > { %1288 = vst [vmem:[%s1804_s16 + $0x30] sm:$0xff] %v799_v5  ;;  %s1278_s12 = sld [smem:[#allocation7 + $0x9]]  ;;  %v854_v47 = vstv %s2084_s6  ;;  %v852_v53 = vmul.f32 %v851_v39, %v2025_v41  ;;  %s931_s6 = scalar_lea.vmem (%p1530_p5), %s2217_s5, %s1294_s7 }
  0xc4   : > { %v820_v42 = vadd.f32 %v819_v4, %v817_v22  ;;  %v832_v43 = vadd.f32 %v831_v18, %v829_v26  ;;  %s2109_s18 = sld [smem:[#allocation6 + $0x46]]  ;;  %v845_v54 = vstv %s2087_s9  ;;  %v855_v59 = vmul.f32 %v854_v47, %v2029_v44 }
  0xc5   : > { %s2113_s13 = sld [smem:[#allocation6 + $0x47]]  ;;  %v857_v55 = vstv %s2092_s10  ;;  %v846_v0 = vmul.f32 %v845_v54, %v2065_v9 }
  0xc6   : > { %v823_v49 = vadd.f32 %v822_v38, %v820_v42  ;;  %v835_v50 = vadd.f32 %v834_v33, %v832_v43  ;;  %s2116_s14 = sld [smem:[#allocation6 + $0x45]]  ;;  %v860_v61 = vstv %s2096_s26  ;;  %v858_v2 = vmul.f32 %v857_v55, %v2033_v48 }
  0xc7   : > { %s2121_s15 = sld [smem:[#allocation6 + $0x48]]  ;;  %v863_v6 = vstv %s2099_s28  ;;  %v861_v12 = vmul.f32 %v860_v61, %v2039_v52 }
  0xc8   : > { %1289 = vst [vmem:[%s1804_s16 + $0x38] sm:$0xff] %v823_v49  ;;  %v838_v57 = vadd.f32 %v837_v45, %v835_v50  ;;  %s2126_s0 = sld [smem:[#allocation6 + $0x49]]  ;;  %v866_v13 = vstv %s2103_s11  ;;  %v864_v19 = vmul.f32 %v863_v6, %v2044_v56  ;;  %v992_v6 = vld [vmem:[%s1804_s16 + $0x28] sm:$0xff] (%p1530_p5) }
  0xc9   : > { %v487_v60 = vstv %s1278_s12  ;;  %s2129_s1 = sld [smem:[#allocation6 + $0x4a]]  ;;  %v867_v24 = vmul.f32 %v866_v13, %v2054_v63  ;;  %993 = vst [vmem:[%s931_s6 + $0x50] sm:$0xff] (%p1530_p5), %v992_v6 }
  0xca   : > { %v841_v62 = vadd.f32 %v840_v51, %v838_v57  ;;  %v853_v1 = vadd.f32 %v852_v53, %v487_v60  ;;  %s2133_s2 = sld [smem:[#allocation6 + $0x4b]]  ;;  %v875_v7 = vstv %s2109_s18 }
  0xcb   : > { %s1279_s20 = sld [smem:[#allocation7 + $0xa]]  ;;  %v878_v15 = vstv %s2113_s13  ;;  %v876_v20 = vmul.f32 %v875_v7, %v2025_v41  ;;  %v994_v7 = vld [vmem:[%s1804_s16 + $0x30] sm:$0xff] (%p1530_p5) }
  0xcc   : > { %v844_v8 = vadd.f32 %v843_v58, %v841_v62  ;;  %v856_v10 = vadd.f32 %v855_v59, %v853_v1  ;;  %s2138_s17 = sld [smem:[#allocation6 + $0x4d]]  ;;  %v869_v21 = vstv %s2116_s14  ;;  %v879_v25 = vmul.f32 %v878_v15, %v2029_v44  ;;  %995 = vst [vmem:[%s931_s6 + $0x60] sm:$0xff] (%p1530_p5), %v994_v7 }
  0xcd   : > { %s2142_s3 = sld [smem:[#allocation6 + $0x4e]]  ;;  %v881_v23 = vstv %s2121_s15  ;;  %v870_v29 = vmul.f32 %v869_v21, %v2065_v9 }
  0xce   : > { %v847_v16 = vadd.f32 %v846_v0, %v844_v8  ;;  %v859_v17 = vadd.f32 %v858_v2, %v856_v10  ;;  %s2145_s4 = sld [smem:[#allocation6 + $0x4c]]  ;;  %v884_v28 = vstv %s2126_s0  ;;  %v882_v30 = vmul.f32 %v881_v23, %v2033_v48  ;;  %v990_v2 = vld [vmem:[%s1804_s16 + $0x20] sm:$0xff] (%p1530_p5) }
  0xcf   : > { %s2150_s19 = sld [smem:[#allocation6 + $0x4f]]  ;;  %v887_v31 = vstv %s2129_s1  ;;  %v885_v4 = vmul.f32 %v884_v28, %v2039_v52  ;;  %991 = vst [vmem:[%s931_s6 + $0x40] sm:$0xff] (%p1530_p5), %v990_v2  ;;  %v996_v8 = vld [vmem:[%s1804_s16 + $0x38] sm:$0xff] (%p1530_p5) }
  0xd0   : > { %1290 = vst [vmem:[%s1804_s16 + $0x40] sm:$0xff] %v847_v16  ;;  %v862_v11 = vadd.f32 %v861_v12, %v859_v17  ;;  %s2156_s25 = sld [smem:[#allocation6 + $0x50]]  ;;  %v890_v18 = vstv %s2133_s2  ;;  %v888_v22 = vmul.f32 %v887_v31, %v2044_v56 }
  0xd1   : > { %v489_v27 = vstv %s1279_s20  ;;  %s2160_s23 = sld [smem:[#allocation6 + $0x51]]  ;;  %v891_v39 = vmul.f32 %v890_v18, %v2054_v63  ;;  %997 = vst [vmem:[%s931_s6 + $0x70] sm:$0xff] (%p1530_p5), %v996_v8 }
  0xd2   : > { %v865_v14 = vadd.f32 %v864_v19, %v862_v11  ;;  %v877_v3 = vadd.f32 %v876_v20, %v489_v27  ;;  %s1280_s24 = sld [smem:[#allocation7 + $0xb]]  ;;  %v899_v32 = vstv %s2138_s17 }
  0xd3   : > { %s1255_s29 = sld [smem:[#allocation6 + $0x52]]  ;;  %v902_v5 = vstv %s2142_s3  ;;  %v900_v38 = vmul.f32 %v899_v32, %v2025_v41 }
  0xd4   : > { %v868_v34 = vadd.f32 %v867_v24, %v865_v14  ;;  %v880_v35 = vadd.f32 %v879_v25, %v877_v3  ;;  %v893_v26 = vstv %s2145_s4  ;;  %s1256_s30 = sld [smem:[#allocation6 + $0x53]]  ;;  %v903_v42 = vmul.f32 %v902_v5, %v2029_v44 }
  0xd5   : > { %v905_v33 = vstv %s2150_s19  ;;  %v894_v47 = vmul.f32 %v893_v26, %v2065_v9 }
  0xd6   : > { %v871_v36 = vadd.f32 %v870_v29, %v868_v34  ;;  %v883_v37 = vadd.f32 %v882_v30, %v880_v35  ;;  %v908_v45 = vstv %s2156_s25  ;;  %v906_v50 = vmul.f32 %v905_v33, %v2033_v48 }
  0xd7   : > { %v911_v51 = vstv %s2160_s23  ;;  %v909_v54 = vmul.f32 %v908_v45, %v2039_v52  ;;  %v982_v52 = vld [vmem:[%s1804_s16] sm:$0xff] (%p1530_p5) }
  0xd8   : > { %1291 = vst [vmem:[%s1804_s16 + $0x48] sm:$0xff] %v871_v36  ;;  %v886_v40 = vadd.f32 %v885_v4, %v883_v37  ;;  %v491_v43 = vstv %s1280_s24  ;;  %v912_v44 = vmul.f32 %v911_v51, %v2044_v56  ;;  %v984_v56 = vld [vmem:[%s1804_s16 + $0x8] sm:$0xff] (%p1530_p5)  ;;  %v998_v10 = vld [vmem:[%s1804_s16 + $0x40] sm:$0xff] (%p1530_p5) }
  0xd9   : > { %v901_v49 = vadd.f32 %v900_v38, %v491_v43  ;;  %v914_v55 = vstv %s1255_s29  ;;  %983 = vst [vmem:[%s931_s6] sm:$0xff] (%p1530_p5), %v982_v52 }
  0xda   : > { %v889_v46 = vadd.f32 %v888_v22, %v886_v40  ;;  %v917_v59 = vstv %s1256_s30  ;;  %v915_v61 = vmul.f32 %v914_v55, %v2054_v63  ;;  %v986_v63 = vld [vmem:[%s1804_s16 + $0x10] sm:$0xff] (%p1530_p5)  ;;  %985 = vst [vmem:[%s931_s6 + $0x10] sm:$0xff] (%p1530_p5), %v984_v56 }
  0xdb   : > { %v904_v53 = vadd.f32 %v903_v42, %v901_v49  ;;  %v918_v0 = vmul.f32 %v917_v59, %v2065_v9  ;;  %v988_v9 = vld [vmem:[%s1804_s16 + $0x18] sm:$0xff] (%p1530_p5)  ;;  %987 = vst [vmem:[%s931_s6 + $0x20] sm:$0xff] (%p1530_p5), %v986_v63 }
  0xdc   : > { %v892_v41 = vadd.f32 %v891_v39, %v889_v46  ;;  %989 = vst [vmem:[%s931_s6 + $0x30] sm:$0xff] (%p1530_p5), %v988_v9 }
  0xdd   : > { %v907_v58 = vadd.f32 %v906_v50, %v904_v53  ;;  %999 = vst [vmem:[%s931_s6 + $0x80] sm:$0xff] (%p1530_p5), %v998_v10 }
  0xde   : > { %v895_v57 = vadd.f32 %v894_v47, %v892_v41 }
  0xdf   : > { %v910_v60 = vadd.f32 %v909_v54, %v907_v58  ;;  %v1000_v12 = vld [vmem:[%s1804_s16 + $0x48] sm:$0xff] (%p1530_p5) }
  0xe0   : > { %1292 = vst [vmem:[%s1804_s16 + $0x50] sm:$0xff] %v895_v57 }
  0xe1   : > { %v913_v62 = vadd.f32 %v912_v44, %v910_v60  ;;  %1001 = vst [vmem:[%s931_s6 + $0x90] sm:$0xff] (%p1530_p5), %v1000_v12 }
  0xe3   : > { %v916_v48 = vadd.f32 %v915_v61, %v913_v62  ;;  %929 = sbr.rel (!%p1530_p5) target bundleno = 240 (0xf0), region = 98 }
  0xe5   : > { %v919_v1 = vadd.f32 %v918_v0, %v916_v48 }
  0xe7   : > { %1293 = vst [vmem:[%s1804_s16 + $0x58] sm:$0xff] %v919_v1  ;;  %v1002_v13 = vld [vmem:[%s1804_s16 + $0x50] sm:$0xff] (%p1530_p5) }
  0xe8   : > { %1003 = vst [vmem:[%s931_s6 + $0xa0] sm:$0xff] %v1002_v13 }
  0xee   : > { %v1004_v15 = vld [vmem:[%s1804_s16 + $0x58] sm:$0xff] }
  0xef   : > { %1005 = vst [vmem:[%s931_s6 + $0xb0] sm:$0xff] %v1004_v15 }
  0xf0 PF: > { %s2239_s20 = sld [smem:[#allocation15_spill]] }
  0xf1   : > { %s2240_s18 = sld [smem:[#allocation14_spill]] }
  0xf2   : > { %s2241_s19 = sld [smem:[#allocation16_spill]] }
  0xf6   : > { %p15_p13 = scmp.ge.s32.totalorder %s2239_s20, 4  }
  0xf8   :  { %17 = sbr.rel (!%p15_p13) target bundleno = 10 (0xa), region = 181 }
  0xfd   :  { %1021 = vsyncpa [#allocation3], 1 }
  0xfe   :  { %1023 = vsyncpa [#allocation3 + $0x1], 1 }
  0xff   :  { %1024 = vsyncpa [#allocation5], 1 }
 0x100   :  { %1025 = vsyncpa [#allocation8], 1 }

</bundles_post_ra>
